<compile_context>
chip_gen: v7x
topology: tpu7x:2x2x1
jax: 0.10.0
libtpu: 0.0.40
codegen_flags: <defaults>
</compile_context>

<pallas_src>
import math
import functools

import jax
import jax.numpy as jnp
from jax import lax
from jax.experimental import pallas as pl
from jax.experimental.pallas import tpu as pltpu


# ----------------------------------------------------------------------------
# Fused encoder kernel: one grid step = (one batch tile, one layer).
# ----------------------------------------------------------------------------
def _encoder_stack_kernel(
        x_ref,
        wqkv_ref, bqkv_ref, wo_ref, bo_ref, g1_ref, be1_ref,
        w1_ref, bf1_ref, w2_ref, bf2_ref, g2_ref, be2_ref,
        o_ref, res_ref,
        *, num_heads, head_dim, eps):
    layer = pl.program_id(1)
    n_layers = pl.num_programs(1)

    # Layer 0: seed the f32 VMEM-resident residual stream for this batch tile.
    @pl.when(layer == 0)
    def _():
        res_ref[...] = x_ref[...].astype(jnp.float32)

    bt, seq, d_model = res_ref.shape
    nh, hd = num_heads, head_dim
    tokens = bt * seq
    f32, bf16 = jnp.float32, jnp.bfloat16

    x = res_ref[...]                                           # (Bt, S, D) f32

    # ---------------- Fused QKV projection (one lane-dense matmul) ----------
    # wqkv columns are packed host-side as [Q | K | V], head-major inside each
    # block, with the 1/sqrt(hd) attention scale already folded into Q.
    x2 = x.reshape(tokens, d_model).astype(bf16)
    qkv = jnp.dot(x2, wqkv_ref[...], preferred_element_type=f32) + bqkv_ref[...]
    qkv = qkv.reshape(bt, seq, 3 * d_model)                    # (Bt, S, 3D) f32

    # ---------------- Per-head attention (trace-time unrolled loop) ---------
    # The score / value matmuls are intrinsically per-head; this is the same
    # MXU op count as a (bt*nh)-batched einsum, without any head<->sequence
    # relayout of the activations.
    vals_per_head = []
    for h in range(nh):
        qh = qkv[:, :, h * hd:(h + 1) * hd]                                  # (Bt,S,hd)
        kh = qkv[:, :, d_model + h * hd:d_model + (h + 1) * hd]
        vh = qkv[:, :, 2 * d_model + h * hd:2 * d_model + (h + 1) * hd]

        s = jnp.einsum('bqe,bke->bqk', qh.astype(bf16), kh.astype(bf16),
                       preferred_element_type=f32)             # (Bt, S, S)
        s = s - jnp.max(s, axis=-1, keepdims=True)             # stable softmax
        p = jnp.exp(s)
        p = p * pl.reciprocal(jnp.sum(p, axis=-1, keepdims=True), approx=True)
        vals_per_head.append(
            jnp.einsum('bqk,bke->bqe', p.astype(bf16), vh.astype(bf16),
                       preferred_element_type=f32))            # (Bt, S, hd)

    # Head-concat along the lane dim, then ONE output projection with K = D.
    vals = jnp.concatenate(vals_per_head, axis=-1)             # (Bt, S, D) f32
    attn = jnp.dot(vals.reshape(tokens, d_model).astype(bf16), wo_ref[...],
                   preferred_element_type=f32) + bo_ref[...]
    attn = attn.reshape(bt, seq, d_model)

    # ---------------- residual + LayerNorm 1 (f32) --------------------------
    h1 = attn + x
    m1 = jnp.mean(h1, axis=-1, keepdims=True)
    c1 = h1 - m1
    v1 = jnp.mean(c1 * c1, axis=-1, keepdims=True)
    h1n = c1 * lax.rsqrt(v1 + eps) * g1_ref[...] + be1_ref[...]

    # ---------------- PositionwiseFeedForward (2-D lane-dense matmuls) ------
    h1n2 = h1n.reshape(tokens, d_model).astype(bf16)
    f = jnp.dot(h1n2, w1_ref[...], preferred_element_type=f32) + bf1_ref[...]
    f = jnp.maximum(f, 0.0)
    f = jnp.dot(f.astype(bf16), w2_ref[...], preferred_element_type=f32) + bf2_ref[...]
    f = f.reshape(bt, seq, d_model)

    # ---------------- residual + LayerNorm 2 (f32) --------------------------
    h2 = f + h1n
    m2 = jnp.mean(h2, axis=-1, keepdims=True)
    c2 = h2 - m2
    v2 = jnp.mean(c2 * c2, axis=-1, keepdims=True)
    out = c2 * lax.rsqrt(v2 + eps) * g2_ref[...] + be2_ref[...]

    res_ref[...] = out                                         # f32 carry

    # Only the last layer stores to the (possibly lower precision) output.
    @pl.when(layer == n_layers - 1)
    def _():
        o_ref[...] = out.astype(o_ref.dtype)


# ----------------------------------------------------------------------------
# Host-side parameter packing: per-layer params -> stacked [L, ...] arrays.
# wqkv / bqkv are reordered to [Q | K | V] blocks (head-major inside each),
# with the 1/sqrt(hd) attention scale folded into Q.
# ----------------------------------------------------------------------------
def _stack_params(params, nh, hd):
    names = ("wqkv", "bqkv", "wo", "bo", "g1", "be1",
             "w1", "bf1", "w2", "bf2", "g2", "be2")
    cols = {k: [] for k in names}
    scale = 1.0 / math.sqrt(hd)
    for p in params:
        d_model = p["wqkv"].shape[0]
        # PyTorch qkv_layer column c -> head c // (3*hd), then [q|k|v] chunks.
        w = p["wqkv"].reshape(d_model, nh, 3, hd).transpose(0, 2, 1, 3)  # (D,3,nh,hd)
        w = w.at[:, 0].multiply(scale)                                   # fold scale into Q
        b = p["bqkv"].reshape(nh, 3, hd).transpose(1, 0, 2)              # (3,nh,hd)
        b = b.at[0].multiply(scale)
        cols["wqkv"].append(w.reshape(d_model, 3 * d_model).astype(jnp.bfloat16))
        cols["bqkv"].append(b.reshape(1, 3 * d_model).astype(jnp.float32))
        cols["wo"].append(p["wo"].astype(jnp.bfloat16))
        cols["bo"].append(p["bo"].reshape(1, d_model))
        cols["g1"].append(p["g1"].reshape(1, d_model))
        cols["be1"].append(p["be1"].reshape(1, d_model))
        cols["w1"].append(p["w1"].astype(jnp.bfloat16))
        cols["bf1"].append(p["bf1"].reshape(1, -1))
        cols["w2"].append(p["w2"].astype(jnp.bfloat16))
        cols["bf2"].append(p["bf2"].reshape(1, d_model))
        cols["g2"].append(p["g2"].reshape(1, d_model))
        cols["be2"].append(p["be2"].reshape(1, d_model))
    return {k: jnp.stack(v, axis=0) for k, v in cols.items()}


def _param_spec(shape_no_layer):
    """BlockSpec for a stacked [L, ...] parameter: squeeze L, full block else."""
    n = len(shape_no_layer)
    return pl.BlockSpec((None,) + tuple(shape_no_layer),
                        lambda b, l, _n=n: (l,) + (0,) * _n)


# ----------------------------------------------------------------------------
# Per-generation sizing (batch tile, VMEM limit).
# ----------------------------------------------------------------------------
def _vmem_limit_bytes():
    """~75% of this device's VMEM (128 MiB v5e/v6e, 64 MiB/TC v7x), capped."""
    try:
        cap = int(pltpu.get_tpu_info().vmem_capacity_bytes)
        return int(min(cap * 3 // 4, 112 * 1024 * 1024))
    except Exception:
        return 32 * 1024 * 1024


def _prefer_multi_tile():
    """True only on chips with >1 TensorCore sharing the 'parallel' grid axis."""
    try:
        kind = jax.devices()[0].device_kind.lower()
    except Exception:
        return False
    return any(t in kind for t in ("v7", "7x", "v5p", "v4", "v3"))


def _estimate_vmem_bytes(bt, S, D, H, weight_bytes):
    act = bt * S * D * 4
    qkv = bt * S * 3 * D * 4
    scores = bt * S * S * 4            # one head processed at a time
    hidden = bt * S * H * 4
    # residual scratch + in/out activation blocks + intermediates
    # + double-buffered per-layer weights.
    return 4 * act + qkv + scores + hidden + 2 * weight_bytes


def _pick_batch_tile(B, S, D, H, vmem_limit):
    weight_bytes = (D * 3 * D + D * D + D * H + H * D) * 2 + (5 * D + H) * 4
    budget = int(0.6 * vmem_limit)
    # Single-TC chips (v5e/v6e): use the whole batch (no weight re-fetch per
    # tile, bigger M).  Multi-TC chips: leave >=2 tiles for the parallel axis.
    start = B
    if _prefer_multi_tile() and B >= 2:
        start = max(d for d in range(1, B // 2 + 1) if B % d == 0)
    bt = 1
    for cand in range(start, 0, -1):
        if B % cand == 0 and _estimate_vmem_bytes(cand, S, D, H, weight_bytes) <= budget:
            bt = cand
            break
    return bt


# ----------------------------------------------------------------------------
# Wrapper.
# ----------------------------------------------------------------------------
def encoder_forward(x, params, num_heads):
    B, S, D = x.shape
    L = len(params)
    assert D % num_heads == 0
    nh = num_heads
    hd = D // nh
    H = params[0]["w1"].shape[1]

    vmem_limit = _vmem_limit_bytes()
    bt = _pick_batch_tile(B, S, D, H, vmem_limit)
    assert B % bt == 0

    st = _stack_params(params, nh, hd)
    kernel = functools.partial(_encoder_stack_kernel,
                               num_heads=nh, head_dim=hd, eps=1e-5)

    # NOTE: correctness of the VMEM-resident residual carry requires the layer
    # axis to be the innermost ("arbitrary") grid axis and the x / output
    # index_maps to ignore it.  Do not reorder the grid.
    in_specs = [
        pl.BlockSpec((bt, S, D), lambda b, l: (b, 0, 0)),   # x (read at layer 0)
        _param_spec((D, 3 * D)),    # wqkv  (bf16, [Q|K|V], scale folded into Q)
        _param_spec((1, 3 * D)),    # bqkv
        _param_spec((D, D)),        # wo
        _param_spec((1, D)),        # bo
        _param_spec((1, D)),        # gamma1
        _param_spec((1, D)),        # beta1
        _param_spec((D, H)),        # ffn w1
        _param_spec((1, H)),        # ffn b1
        _param_spec((H, D)),        # ffn w2
        _param_spec((1, D)),        # ffn b2
        _param_spec((1, D)),        # gamma2
        _param_spec((1, D)),        # beta2
    ]

    return pl.pallas_call(
        kernel,
        out_shape=jax.ShapeDtypeStruct((B, S, D), x.dtype),
        grid=(B // bt, L),
        in_specs=in_specs,
        out_specs=pl.BlockSpec((bt, S, D), lambda b, l: (b, 0, 0)),
        scratch_shapes=[pltpu.VMEM((bt, S, D), jnp.float32)],   # f32 residual carry
        compiler_params=pltpu.CompilerParams(
            dimension_semantics=("parallel", "arbitrary"),
            vmem_limit_bytes=vmem_limit),
    )(x, st["wqkv"], st["bqkv"], st["wo"], st["bo"], st["g1"], st["be1"],
      st["w1"], st["bf1"], st["w2"], st["bf2"], st["g2"], st["be2"])


# ----------------------------------------------------------------------------
# Parameters (PyTorch-module layout: wqkv = qkv_layer.weight.T, etc.)
# ----------------------------------------------------------------------------
def make_params(key, d_model, ffn_hidden, num_layers):
    params = []
    for _ in range(num_layers):
        key, *ks = jax.random.split(key, 9)
        sd = 1.0 / math.sqrt(d_model)
        sh = 1.0 / math.sqrt(ffn_hidden)
        params.append(dict(
            wqkv=jax.random.normal(ks[0], (d_model, 3 * d_model), jnp.float32) * sd,
            bqkv=jax.random.normal(ks[1], (3 * d_model,), jnp.float32) * 0.02,
            wo=jax.random.normal(ks[2], (d_model, d_model), jnp.float32) * sd,
            bo=jax.random.normal(ks[3], (d_model,), jnp.float32) * 0.02,
            g1=jnp.ones((d_model,), jnp.float32),
            be1=jnp.zeros((d_model,), jnp.float32),
            w1=jax.random.normal(ks[4], (d_model, ffn_hidden), jnp.float32) * sd,
            bf1=jax.random.normal(ks[5], (ffn_hidden,), jnp.float32) * 0.02,
            w2=jax.random.normal(ks[6], (ffn_hidden, d_model), jnp.float32) * sh,
            bf2=jax.random.normal(ks[7], (d_model,), jnp.float32) * 0.02,
            g2=jnp.ones((d_model,), jnp.float32),
            be2=jnp.zeros((d_model,), jnp.float32),
        ))
    return params


# ----------------------------------------------------------------------------
# Pure-JAX reference (same intended semantics, same bf16-matmul policy).
# ----------------------------------------------------------------------------
def encoder_reference(x, params, num_heads):
    f32, bf16 = jnp.float32, jnp.bfloat16
    B, S, D = x.shape
    nh = num_heads
    hd = D // nh
    eps = 1e-5

    def mm(a, b):
        return jnp.dot(a.astype(bf16), b.astype(bf16), preferred_element_type=f32)

    def layernorm(h, g, b):
        m = jnp.mean(h, -1, keepdims=True)
        v = jnp.mean((h - m) ** 2, -1, keepdims=True)
        return g * (h - m) / jnp.sqrt(v + eps) + b

    h = x.astype(f32)
    for p in params:
        qkv = mm(h.reshape(B * S, D), p["wqkv"]).reshape(B, S, 3 * D) + p["bqkv"]
        qkv = qkv.reshape(B, S, nh, 3 * hd).transpose(0, 2, 1, 3)   # (B, nh, S, 3hd)
        q, k, v = qkv[..., :hd], qkv[..., hd:2 * hd], qkv[..., 2 * hd:]
        s = jnp.einsum('bhqd,bhkd->bhqk', (q / math.sqrt(hd)).astype(bf16),
                       k.astype(bf16), preferred_element_type=f32)
        att = jax.nn.softmax(s, axis=-1)
        vals = jnp.einsum('bhqk,bhkd->bhqd', att.astype(bf16), v.astype(bf16),
                          preferred_element_type=f32)
        vals = vals.transpose(0, 2, 1, 3).reshape(B, S, D)
        attn = mm(vals.reshape(B * S, D), p["wo"]).reshape(B, S, D) + p["bo"]
        h1 = layernorm(attn + h, p["g1"], p["be1"])
        f = jnp.maximum(mm(h1.reshape(B * S, D), p["w1"]) + p["bf1"], 0.0)
        f = mm(f, p["w2"]).reshape(B, S, D) + p["bf2"]
        h = layernorm(f + h1, p["g2"], p["be2"])
    return h


if __name__ == "__main__":
    # Small config consistent with the module: d_model=32, ffn_hidden=64,
    # num_heads=4, num_layers=2, drop_prob ignored (eval), batch=2, seq=8.
    d_model, ffn_hidden, num_heads, num_layers = 32, 64, 4, 2
    B, S = 2, 8

    key = jax.random.PRNGKey(0)
    kx, kp = jax.random.split(key)
    x = jax.random.normal(kx, (B, S, d_model), jnp.float32)
    params = make_params(kp, d_model, ffn_hidden, num_layers)

    out = encoder_forward(x, params, num_heads)
    jax.block_until_ready(out)
    assert out.shape == (B, S, d_model)
    assert bool(jnp.all(jnp.isfinite(out)))

    ref = encoder_reference(x, params, num_heads)
    max_err = float(jnp.max(jnp.abs(out - ref)))
    # Loose tolerance: bf16 matmul operands + approximate EUP reciprocal.
    assert max_err < 1e-1, f"max abs err {max_err}"
    print("KERNEL_OK")
</pallas_src>

<mosaic_0001>
module attributes {stable_mosaic.version = 11 : i64} {
  func.func @_encoder_stack_kernel(%arg0: i32, %arg1: i32, %arg2: memref<2x8x32xf32, #tpu.memory_space<vmem>>, %arg3: memref<1x32x96xbf16, #tpu.memory_space<vmem>>, %arg4: memref<1x1x96xf32, #tpu.memory_space<vmem>>, %arg5: memref<1x32x32xbf16, #tpu.memory_space<vmem>>, %arg6: memref<1x1x32xf32, #tpu.memory_space<vmem>>, %arg7: memref<1x1x32xf32, #tpu.memory_space<vmem>>, %arg8: memref<1x1x32xf32, #tpu.memory_space<vmem>>, %arg9: memref<1x32x64xbf16, #tpu.memory_space<vmem>>, %arg10: memref<1x1x64xf32, #tpu.memory_space<vmem>>, %arg11: memref<1x64x32xbf16, #tpu.memory_space<vmem>>, %arg12: memref<1x1x32xf32, #tpu.memory_space<vmem>>, %arg13: memref<1x1x32xf32, #tpu.memory_space<vmem>>, %arg14: memref<1x1x32xf32, #tpu.memory_space<vmem>>, %arg15: memref<2x8x32xf32, #tpu.memory_space<vmem>>, %arg16: memref<2x8x32xf32, #tpu.memory_space<vmem>>) attributes {dimension_semantics = [#tpu.dimension_semantics<parallel>, #tpu.dimension_semantics<arbitrary>], iteration_bounds = array<i64: 1, 2>, scalar_prefetch = 0 : i64, scratch_operands = 1 : i64, tpu.core_type = #tpu.core_type<tc>, window_params = [{transform_indices = @transform_0, window_bounds = array<i64: 2, 8, 32>}, {transform_indices = @transform_1, window_bounds = array<i64: 1, 32, 96>}, {transform_indices = @transform_2, window_bounds = array<i64: 1, 1, 96>}, {transform_indices = @transform_3, window_bounds = array<i64: 1, 32, 32>}, {transform_indices = @transform_4, window_bounds = array<i64: 1, 1, 32>}, {transform_indices = @transform_5, window_bounds = array<i64: 1, 1, 32>}, {transform_indices = @transform_6, window_bounds = array<i64: 1, 1, 32>}, {transform_indices = @transform_7, window_bounds = array<i64: 1, 32, 64>}, {transform_indices = @transform_8, window_bounds = array<i64: 1, 1, 64>}, {transform_indices = @transform_9, window_bounds = array<i64: 1, 64, 32>}, {transform_indices = @transform_10, window_bounds = array<i64: 1, 1, 32>}, {transform_indices = @transform_11, window_bounds = array<i64: 1, 1, 32>}, {transform_indices = @transform_12, window_bounds = array<i64: 1, 1, 32>}, {transform_indices = @transform_13, window_bounds = array<i64: 2, 8, 32>}]} {
    %c0_i32 = arith.constant 0 : i32
    %0 = arith.cmpi eq, %arg1, %c0_i32 : i32
    %1 = arith.extui %0 : i1 to i32
    %c0_i32_0 = arith.constant 0 : i32
    %2 = arith.cmpi ne, %1, %c0_i32_0 : i32
    scf.if %2 {
      %c0_73 = arith.constant 0 : index
      %c0_74 = arith.constant 0 : index
      %c0_75 = arith.constant 0 : index
      %179 = vector.load %arg2[%c0_73, %c0_74, %c0_75] : memref<2x8x32xf32, #tpu.memory_space<vmem>>, vector<2x8x32xf32>
      %c0_76 = arith.constant 0 : index
      %c0_77 = arith.constant 0 : index
      %c0_78 = arith.constant 0 : index
      %180 = vector.load %arg16[%c0_76, %c0_77, %c0_78] : memref<2x8x32xf32, #tpu.memory_space<vmem>>, vector<2x8x32xf32>
      tpu.vector_store %arg16[%c0_76, %c0_77, %c0_78], %179 {strides = array<i32>} : memref<2x8x32xf32, #tpu.memory_space<vmem>>, vector<2x8x32xf32>,
    } else {
    }
    %c0 = arith.constant 0 : index
    %c0_1 = arith.constant 0 : index
    %c0_2 = arith.constant 0 : index
    %3 = vector.load %arg16[%c0, %c0_1, %c0_2] : memref<2x8x32xf32, #tpu.memory_space<vmem>>, vector<2x8x32xf32>
    %4 = vector.shape_cast %3 : vector<2x8x32xf32> to vector<16x32xf32>
    %5 = arith.truncf %4 : vector<16x32xf32> to vector<16x32xbf16>
    %c0_3 = arith.constant 0 : index
    %c0_4 = arith.constant 0 : index
    %c0_5 = arith.constant 0 : index
    %6 = vector.load %arg3[%c0_3, %c0_4, %c0_5] : memref<1x32x96xbf16, #tpu.memory_space<vmem>>, vector<1x32x96xbf16>
    %7 = vector.shape_cast %6 : vector<1x32x96xbf16> to vector<32x96xbf16>
    %cst = arith.constant dense<0.000000e+00> : vector<16x96xf32>
    %8 = tpu.matmul %5, %7, %cst {dimension_numbers = #tpu.dot_dimension_numbers<[1], [0], [0], [1], [0, 0, 1, 1], [], []>} : vector<16x32xbf16>, vector<32x96xbf16>, vector<16x96xf32> -> vector<16x96xf32>
    %c0_6 = arith.constant 0 : index
    %c0_7 = arith.constant 0 : index
    %c0_8 = arith.constant 0 : index
    %9 = vector.load %arg4[%c0_6, %c0_7, %c0_8] : memref<1x1x96xf32, #tpu.memory_space<vmem>>, vector<1x1x96xf32>
    %10 = vector.shape_cast %9 : vector<1x1x96xf32> to vector<1x96xf32>
    %11 = vector.broadcast %10 : vector<1x96xf32> to vector<16x96xf32>
    %12 = arith.addf %8, %11 : vector<16x96xf32>
    %13 = vector.shape_cast %12 : vector<16x96xf32> to vector<2x8x96xf32>
    %14 = vector.extract_strided_slice %13 {offsets = [0, 0, 0], sizes = [2, 8, 8], strides = [1, 1, 1]} : vector<2x8x96xf32> to vector<2x8x8xf32>
    %15 = vector.extract_strided_slice %13 {offsets = [0, 0, 32], sizes = [2, 8, 8], strides = [1, 1, 1]} : vector<2x8x96xf32> to vector<2x8x8xf32>
    %16 = vector.extract_strided_slice %13 {offsets = [0, 0, 64], sizes = [2, 8, 8], strides = [1, 1, 1]} : vector<2x8x96xf32> to vector<2x8x8xf32>
    %17 = arith.truncf %14 : vector<2x8x8xf32> to vector<2x8x8xbf16>
    %18 = arith.truncf %15 : vector<2x8x8xf32> to vector<2x8x8xbf16>
    "tpu.trace_start"() <{level = 10 : i32, message = "bqe,bke->bqk"}> : () -> ()
    %cst_9 = arith.constant dense<0.000000e+00> : vector<2x8x8xf32>
    %19 = tpu.matmul %17, %18, %cst_9 {dimension_numbers = #tpu.dot_dimension_numbers<[2], [2], [1], [1], [0, 0, 0, 1, 1, 1], [0], [0]>} : vector<2x8x8xbf16>, vector<2x8x8xbf16>, vector<2x8x8xf32> -> vector<2x8x8xf32>
    "tpu.trace_stop"() : () -> ()
    %cst_10 = arith.constant dense<0xFF800000> : vector<2x8xf32>
    %20 = vector.multi_reduction <maximumf>, %19, %cst_10 [2] : vector<2x8x8xf32> to vector<2x8xf32>
    %21 = vector.shape_cast %20 : vector<2x8xf32> to vector<2x8x1xf32>
    %22 = vector.broadcast %21 : vector<2x8x1xf32> to vector<2x8x8xf32>
    %23 = arith.subf %19, %22 : vector<2x8x8xf32>
    %24 = math.exp %23 : vector<2x8x8xf32>
    %cst_11 = arith.constant dense<0.000000e+00> : vector<2x8xf32>
    %25 = vector.multi_reduction <add>, %24, %cst_11 [2] : vector<2x8x8xf32> to vector<2x8xf32>
    %26 = vector.shape_cast %25 : vector<2x8xf32> to vector<2x8x1xf32>
    %27 = tpu.reciprocal %26 {approx = true} : vector<2x8x1xf32> -> vector<2x8x1xf32>
    %28 = vector.broadcast %27 : vector<2x8x1xf32> to vector<2x8x8xf32>
    %29 = arith.mulf %24, %28 : vector<2x8x8xf32>
    %30 = arith.truncf %29 : vector<2x8x8xf32> to vector<2x8x8xbf16>
    %31 = arith.truncf %16 : vector<2x8x8xf32> to vector<2x8x8xbf16>
    "tpu.trace_start"() <{level = 10 : i32, message = "bqk,bke->bqe"}> : () -> ()
    %cst_12 = arith.constant dense<0.000000e+00> : vector<2x8x8xf32>
    %32 = tpu.matmul %30, %31, %cst_12 {dimension_numbers = #tpu.dot_dimension_numbers<[2], [1], [1], [2], [0, 0, 0, 1, 1, 2], [0], [0]>} : vector<2x8x8xbf16>, vector<2x8x8xbf16>, vector<2x8x8xf32> -> vector<2x8x8xf32>
    "tpu.trace_stop"() : () -> ()
    %33 = vector.extract_strided_slice %13 {offsets = [0, 0, 8], sizes = [2, 8, 8], strides = [1, 1, 1]} : vector<2x8x96xf32> to vector<2x8x8xf32>
    %34 = vector.extract_strided_slice %13 {offsets = [0, 0, 40], sizes = [2, 8, 8], strides = [1, 1, 1]} : vector<2x8x96xf32> to vector<2x8x8xf32>
    %35 = vector.extract_strided_slice %13 {offsets = [0, 0, 72], sizes = [2, 8, 8], strides = [1, 1, 1]} : vector<2x8x96xf32> to vector<2x8x8xf32>
    %36 = arith.truncf %33 : vector<2x8x8xf32> to vector<2x8x8xbf16>
    %37 = arith.truncf %34 : vector<2x8x8xf32> to vector<2x8x8xbf16>
    "tpu.trace_start"() <{level = 10 : i32, message = "bqe,bke->bqk"}> : () -> ()
    %cst_13 = arith.constant dense<0.000000e+00> : vector<2x8x8xf32>
    %38 = tpu.matmul %36, %37, %cst_13 {dimension_numbers = #tpu.dot_dimension_numbers<[2], [2], [1], [1], [0, 0, 0, 1, 1, 1], [0], [0]>} : vector<2x8x8xbf16>, vector<2x8x8xbf16>, vector<2x8x8xf32> -> vector<2x8x8xf32>
    "tpu.trace_stop"() : () -> ()
    %cst_14 = arith.constant dense<0xFF800000> : vector<2x8xf32>
    %39 = vector.multi_reduction <maximumf>, %38, %cst_14 [2] : vector<2x8x8xf32> to vector<2x8xf32>
    %40 = vector.shape_cast %39 : vector<2x8xf32> to vector<2x8x1xf32>
    %41 = vector.broadcast %40 : vector<2x8x1xf32> to vector<2x8x8xf32>
    %42 = arith.subf %38, %41 : vector<2x8x8xf32>
    %43 = math.exp %42 : vector<2x8x8xf32>
    %cst_15 = arith.constant dense<0.000000e+00> : vector<2x8xf32>
    %44 = vector.multi_reduction <add>, %43, %cst_15 [2] : vector<2x8x8xf32> to vector<2x8xf32>
    %45 = vector.shape_cast %44 : vector<2x8xf32> to vector<2x8x1xf32>
    %46 = tpu.reciprocal %45 {approx = true} : vector<2x8x1xf32> -> vector<2x8x1xf32>
    %47 = vector.broadcast %46 : vector<2x8x1xf32> to vector<2x8x8xf32>
    %48 = arith.mulf %43, %47 : vector<2x8x8xf32>
    %49 = arith.truncf %48 : vector<2x8x8xf32> to vector<2x8x8xbf16>
    %50 = arith.truncf %35 : vector<2x8x8xf32> to vector<2x8x8xbf16>
    "tpu.trace_start"() <{level = 10 : i32, message = "bqk,bke->bqe"}> : () -> ()
    %cst_16 = arith.constant dense<0.000000e+00> : vector<2x8x8xf32>
    %51 = tpu.matmul %49, %50, %cst_16 {dimension_numbers = #tpu.dot_dimension_numbers<[2], [1], [1], [2], [0, 0, 0, 1, 1, 2], [0], [0]>} : vector<2x8x8xbf16>, vector<2x8x8xbf16>, vector<2x8x8xf32> -> vector<2x8x8xf32>
    "tpu.trace_stop"() : () -> ()
    %52 = vector.extract_strided_slice %13 {offsets = [0, 0, 16], sizes = [2, 8, 8], strides = [1, 1, 1]} : vector<2x8x96xf32> to vector<2x8x8xf32>
    %53 = vector.extract_strided_slice %13 {offsets = [0, 0, 48], sizes = [2, 8, 8], strides = [1, 1, 1]} : vector<2x8x96xf32> to vector<2x8x8xf32>
    %54 = vector.extract_strided_slice %13 {offsets = [0, 0, 80], sizes = [2, 8, 8], strides = [1, 1, 1]} : vector<2x8x96xf32> to vector<2x8x8xf32>
    %55 = arith.truncf %52 : vector<2x8x8xf32> to vector<2x8x8xbf16>
    %56 = arith.truncf %53 : vector<2x8x8xf32> to vector<2x8x8xbf16>
    "tpu.trace_start"() <{level = 10 : i32, message = "bqe,bke->bqk"}> : () -> ()
    %cst_17 = arith.constant dense<0.000000e+00> : vector<2x8x8xf32>
    %57 = tpu.matmul %55, %56, %cst_17 {dimension_numbers = #tpu.dot_dimension_numbers<[2], [2], [1], [1], [0, 0, 0, 1, 1, 1], [0], [0]>} : vector<2x8x8xbf16>, vector<2x8x8xbf16>, vector<2x8x8xf32> -> vector<2x8x8xf32>
    "tpu.trace_stop"() : () -> ()
    %cst_18 = arith.constant dense<0xFF800000> : vector<2x8xf32>
    %58 = vector.multi_reduction <maximumf>, %57, %cst_18 [2] : vector<2x8x8xf32> to vector<2x8xf32>
    %59 = vector.shape_cast %58 : vector<2x8xf32> to vector<2x8x1xf32>
    %60 = vector.broadcast %59 : vector<2x8x1xf32> to vector<2x8x8xf32>
    %61 = arith.subf %57, %60 : vector<2x8x8xf32>
    %62 = math.exp %61 : vector<2x8x8xf32>
    %cst_19 = arith.constant dense<0.000000e+00> : vector<2x8xf32>
    %63 = vector.multi_reduction <add>, %62, %cst_19 [2] : vector<2x8x8xf32> to vector<2x8xf32>
    %64 = vector.shape_cast %63 : vector<2x8xf32> to vector<2x8x1xf32>
    %65 = tpu.reciprocal %64 {approx = true} : vector<2x8x1xf32> -> vector<2x8x1xf32>
    %66 = vector.broadcast %65 : vector<2x8x1xf32> to vector<2x8x8xf32>
    %67 = arith.mulf %62, %66 : vector<2x8x8xf32>
    %68 = arith.truncf %67 : vector<2x8x8xf32> to vector<2x8x8xbf16>
    %69 = arith.truncf %54 : vector<2x8x8xf32> to vector<2x8x8xbf16>
    "tpu.trace_start"() <{level = 10 : i32, message = "bqk,bke->bqe"}> : () -> ()
    %cst_20 = arith.constant dense<0.000000e+00> : vector<2x8x8xf32>
    %70 = tpu.matmul %68, %69, %cst_20 {dimension_numbers = #tpu.dot_dimension_numbers<[2], [1], [1], [2], [0, 0, 0, 1, 1, 2], [0], [0]>} : vector<2x8x8xbf16>, vector<2x8x8xbf16>, vector<2x8x8xf32> -> vector<2x8x8xf32>
    "tpu.trace_stop"() : () -> ()
    %71 = vector.extract_strided_slice %13 {offsets = [0, 0, 24], sizes = [2, 8, 8], strides = [1, 1, 1]} : vector<2x8x96xf32> to vector<2x8x8xf32>
    %72 = vector.extract_strided_slice %13 {offsets = [0, 0, 56], sizes = [2, 8, 8], strides = [1, 1, 1]} : vector<2x8x96xf32> to vector<2x8x8xf32>
    %73 = vector.extract_strided_slice %13 {offsets = [0, 0, 88], sizes = [2, 8, 8], strides = [1, 1, 1]} : vector<2x8x96xf32> to vector<2x8x8xf32>
    %74 = arith.truncf %71 : vector<2x8x8xf32> to vector<2x8x8xbf16>
    %75 = arith.truncf %72 : vector<2x8x8xf32> to vector<2x8x8xbf16>
    "tpu.trace_start"() <{level = 10 : i32, message = "bqe,bke->bqk"}> : () -> ()
    %cst_21 = arith.constant dense<0.000000e+00> : vector<2x8x8xf32>
    %76 = tpu.matmul %74, %75, %cst_21 {dimension_numbers = #tpu.dot_dimension_numbers<[2], [2], [1], [1], [0, 0, 0, 1, 1, 1], [0], [0]>} : vector<2x8x8xbf16>, vector<2x8x8xbf16>, vector<2x8x8xf32> -> vector<2x8x8xf32>
    "tpu.trace_stop"() : () -> ()
    %cst_22 = arith.constant dense<0xFF800000> : vector<2x8xf32>
    %77 = vector.multi_reduction <maximumf>, %76, %cst_22 [2] : vector<2x8x8xf32> to vector<2x8xf32>
    %78 = vector.shape_cast %77 : vector<2x8xf32> to vector<2x8x1xf32>
    %79 = vector.broadcast %78 : vector<2x8x1xf32> to vector<2x8x8xf32>
    %80 = arith.subf %76, %79 : vector<2x8x8xf32>
    %81 = math.exp %80 : vector<2x8x8xf32>
    %cst_23 = arith.constant dense<0.000000e+00> : vector<2x8xf32>
    %82 = vector.multi_reduction <add>, %81, %cst_23 [2] : vector<2x8x8xf32> to vector<2x8xf32>
    %83 = vector.shape_cast %82 : vector<2x8xf32> to vector<2x8x1xf32>
    %84 = tpu.reciprocal %83 {approx = true} : vector<2x8x1xf32> -> vector<2x8x1xf32>
    %85 = vector.broadcast %84 : vector<2x8x1xf32> to vector<2x8x8xf32>
    %86 = arith.mulf %81, %85 : vector<2x8x8xf32>
    %87 = arith.truncf %86 : vector<2x8x8xf32> to vector<2x8x8xbf16>
    %88 = arith.truncf %73 : vector<2x8x8xf32> to vector<2x8x8xbf16>
    "tpu.trace_start"() <{level = 10 : i32, message = "bqk,bke->bqe"}> : () -> ()
    %cst_24 = arith.constant dense<0.000000e+00> : vector<2x8x8xf32>
    %89 = tpu.matmul %87, %88, %cst_24 {dimension_numbers = #tpu.dot_dimension_numbers<[2], [1], [1], [2], [0, 0, 0, 1, 1, 2], [0], [0]>} : vector<2x8x8xbf16>, vector<2x8x8xbf16>, vector<2x8x8xf32> -> vector<2x8x8xf32>
    "tpu.trace_stop"() : () -> ()
    %90 = tpu.concatenate %32, %51, %70, %89 in 2 : vector<2x8x8xf32>, vector<2x8x8xf32>, vector<2x8x8xf32>, vector<2x8x8xf32> -> vector<2x8x32xf32>
    %91 = vector.shape_cast %90 : vector<2x8x32xf32> to vector<16x32xf32>
    %92 = arith.truncf %91 : vector<16x32xf32> to vector<16x32xbf16>
    %c0_25 = arith.constant 0 : index
    %c0_26 = arith.constant 0 : index
    %c0_27 = arith.constant 0 : index
    %93 = vector.load %arg5[%c0_25, %c0_26, %c0_27] : memref<1x32x32xbf16, #tpu.memory_space<vmem>>, vector<1x32x32xbf16>
    %94 = vector.shape_cast %93 : vector<1x32x32xbf16> to vector<32x32xbf16>
    %cst_28 = arith.constant dense<0.000000e+00> : vector<16x32xf32>
    %95 = tpu.matmul %92, %94, %cst_28 {dimension_numbers = #tpu.dot_dimension_numbers<[1], [0], [0], [1], [0, 0, 1, 1], [], []>} : vector<16x32xbf16>, vector<32x32xbf16>, vector<16x32xf32> -> vector<16x32xf32>
    %c0_29 = arith.constant 0 : index
    %c0_30 = arith.constant 0 : index
    %c0_31 = arith.constant 0 : index
    %96 = vector.load %arg6[%c0_29, %c0_30, %c0_31] : memref<1x1x32xf32, #tpu.memory_space<vmem>>, vector<1x1x32xf32>
    %97 = vector.shape_cast %96 : vector<1x1x32xf32> to vector<1x32xf32>
    %98 = vector.broadcast %97 : vector<1x32xf32> to vector<16x32xf32>
    %99 = arith.addf %95, %98 : vector<16x32xf32>
    %100 = vector.shape_cast %99 : vector<16x32xf32> to vector<2x8x32xf32>
    %101 = arith.addf %100, %3 : vector<2x8x32xf32>
    %cst_32 = arith.constant dense<0.000000e+00> : vector<2x8xf32>
    %102 = vector.multi_reduction <add>, %101, %cst_32 [2] : vector<2x8x32xf32> to vector<2x8xf32>
    %103 = vector.shape_cast %102 : vector<2x8xf32> to vector<2x8x1xf32>
    %cst_33 = arith.constant 3.200000e+01 : f32
    %104 = vector.broadcast %cst_33 : f32 to vector<2x8x1xf32>
    %105 = arith.divf %103, %104 : vector<2x8x1xf32>
    %106 = vector.broadcast %105 : vector<2x8x1xf32> to vector<2x8x32xf32>
    %107 = arith.subf %101, %106 : vector<2x8x32xf32>
    %108 = arith.mulf %107, %107 : vector<2x8x32xf32>
    %cst_34 = arith.constant dense<0.000000e+00> : vector<2x8xf32>
    %109 = vector.multi_reduction <add>, %108, %cst_34 [2] : vector<2x8x32xf32> to vector<2x8xf32>
    %110 = vector.shape_cast %109 : vector<2x8xf32> to vector<2x8x1xf32>
    %cst_35 = arith.constant 3.200000e+01 : f32
    %111 = vector.broadcast %cst_35 : f32 to vector<2x8x1xf32>
    %112 = arith.divf %110, %111 : vector<2x8x1xf32>
    %cst_36 = arith.constant 9.99999974E-6 : f32
    %113 = vector.broadcast %cst_36 : f32 to vector<2x8x1xf32>
    %114 = arith.addf %112, %113 : vector<2x8x1xf32>
    %115 = math.rsqrt %114 : vector<2x8x1xf32>
    %116 = vector.broadcast %115 : vector<2x8x1xf32> to vector<2x8x32xf32>
    %117 = arith.mulf %107, %116 : vector<2x8x32xf32>
    %c0_37 = arith.constant 0 : index
    %c0_38 = arith.constant 0 : index
    %c0_39 = arith.constant 0 : index
    %118 = vector.load %arg7[%c0_37, %c0_38, %c0_39] : memref<1x1x32xf32, #tpu.memory_space<vmem>>, vector<1x1x32xf32>
    %119 = vector.shape_cast %118 : vector<1x1x32xf32> to vector<1x32xf32>
    %120 = vector.shape_cast %119 : vector<1x32xf32> to vector<1x1x32xf32>
    %121 = vector.broadcast %120 : vector<1x1x32xf32> to vector<2x8x32xf32>
    %122 = arith.mulf %117, %121 : vector<2x8x32xf32>
    %c0_40 = arith.constant 0 : index
    %c0_41 = arith.constant 0 : index
    %c0_42 = arith.constant 0 : index
    %123 = vector.load %arg8[%c0_40, %c0_41, %c0_42] : memref<1x1x32xf32, #tpu.memory_space<vmem>>, vector<1x1x32xf32>
    %124 = vector.shape_cast %123 : vector<1x1x32xf32> to vector<1x32xf32>
    %125 = vector.shape_cast %124 : vector<1x32xf32> to vector<1x1x32xf32>
    %126 = vector.broadcast %125 : vector<1x1x32xf32> to vector<2x8x32xf32>
    %127 = arith.addf %122, %126 : vector<2x8x32xf32>
    %128 = vector.shape_cast %127 : vector<2x8x32xf32> to vector<16x32xf32>
    %129 = arith.truncf %128 : vector<16x32xf32> to vector<16x32xbf16>
    %c0_43 = arith.constant 0 : index
    %c0_44 = arith.constant 0 : index
    %c0_45 = arith.constant 0 : index
    %130 = vector.load %arg9[%c0_43, %c0_44, %c0_45] : memref<1x32x64xbf16, #tpu.memory_space<vmem>>, vector<1x32x64xbf16>
    %131 = vector.shape_cast %130 : vector<1x32x64xbf16> to vector<32x64xbf16>
    %cst_46 = arith.constant dense<0.000000e+00> : vector<16x64xf32>
    %132 = tpu.matmul %129, %131, %cst_46 {dimension_numbers = #tpu.dot_dimension_numbers<[1], [0], [0], [1], [0, 0, 1, 1], [], []>} : vector<16x32xbf16>, vector<32x64xbf16>, vector<16x64xf32> -> vector<16x64xf32>
    %c0_47 = arith.constant 0 : index
    %c0_48 = arith.constant 0 : index
    %c0_49 = arith.constant 0 : index
    %133 = vector.load %arg10[%c0_47, %c0_48, %c0_49] : memref<1x1x64xf32, #tpu.memory_space<vmem>>, vector<1x1x64xf32>
    %134 = vector.shape_cast %133 : vector<1x1x64xf32> to vector<1x64xf32>
    %135 = vector.broadcast %134 : vector<1x64xf32> to vector<16x64xf32>
    %136 = arith.addf %132, %135 : vector<16x64xf32>
    %cst_50 = arith.constant 0.000000e+00 : f32
    %137 = vector.broadcast %cst_50 : f32 to vector<16x64xf32>
    %138 = arith.maximumf %136, %137 : vector<16x64xf32>
    %139 = arith.truncf %138 : vector<16x64xf32> to vector<16x64xbf16>
    %c0_51 = arith.constant 0 : index
    %c0_52 = arith.constant 0 : index
    %c0_53 = arith.constant 0 : index
    %140 = vector.load %arg11[%c0_51, %c0_52, %c0_53] : memref<1x64x32xbf16, #tpu.memory_space<vmem>>, vector<1x64x32xbf16>
    %141 = vector.shape_cast %140 : vector<1x64x32xbf16> to vector<64x32xbf16>
    %cst_54 = arith.constant dense<0.000000e+00> : vector<16x32xf32>
    %142 = tpu.matmul %139, %141, %cst_54 {dimension_numbers = #tpu.dot_dimension_numbers<[1], [0], [0], [1], [0, 0, 1, 1], [], []>} : vector<16x64xbf16>, vector<64x32xbf16>, vector<16x32xf32> -> vector<16x32xf32>
    %c0_55 = arith.constant 0 : index
    %c0_56 = arith.constant 0 : index
    %c0_57 = arith.constant 0 : index
    %143 = vector.load %arg12[%c0_55, %c0_56, %c0_57] : memref<1x1x32xf32, #tpu.memory_space<vmem>>, vector<1x1x32xf32>
    %144 = vector.shape_cast %143 : vector<1x1x32xf32> to vector<1x32xf32>
    %145 = vector.broadcast %144 : vector<1x32xf32> to vector<16x32xf32>
    %146 = arith.addf %142, %145 : vector<16x32xf32>
    %147 = vector.shape_cast %146 : vector<16x32xf32> to vector<2x8x32xf32>
    %148 = arith.addf %147, %127 : vector<2x8x32xf32>
    %cst_58 = arith.constant dense<0.000000e+00> : vector<2x8xf32>
    %149 = vector.multi_reduction <add>, %148, %cst_58 [2] : vector<2x8x32xf32> to vector<2x8xf32>
    %150 = vector.shape_cast %149 : vector<2x8xf32> to vector<2x8x1xf32>
    %cst_59 = arith.constant 3.200000e+01 : f32
    %151 = vector.broadcast %cst_59 : f32 to vector<2x8x1xf32>
    %152 = arith.divf %150, %151 : vector<2x8x1xf32>
    %153 = vector.broadcast %152 : vector<2x8x1xf32> to vector<2x8x32xf32>
    %154 = arith.subf %148, %153 : vector<2x8x32xf32>
    %155 = arith.mulf %154, %154 : vector<2x8x32xf32>
    %cst_60 = arith.constant dense<0.000000e+00> : vector<2x8xf32>
    %156 = vector.multi_reduction <add>, %155, %cst_60 [2] : vector<2x8x32xf32> to vector<2x8xf32>
    %157 = vector.shape_cast %156 : vector<2x8xf32> to vector<2x8x1xf32>
    %cst_61 = arith.constant 3.200000e+01 : f32
    %158 = vector.broadcast %cst_61 : f32 to vector<2x8x1xf32>
    %159 = arith.divf %157, %158 : vector<2x8x1xf32>
    %cst_62 = arith.constant 9.99999974E-6 : f32
    %160 = vector.broadcast %cst_62 : f32 to vector<2x8x1xf32>
    %161 = arith.addf %159, %160 : vector<2x8x1xf32>
    %162 = math.rsqrt %161 : vector<2x8x1xf32>
    %163 = vector.broadcast %162 : vector<2x8x1xf32> to vector<2x8x32xf32>
    %164 = arith.mulf %154, %163 : vector<2x8x32xf32>
    %c0_63 = arith.constant 0 : index
    %c0_64 = arith.constant 0 : index
    %c0_65 = arith.constant 0 : index
    %165 = vector.load %arg13[%c0_63, %c0_64, %c0_65] : memref<1x1x32xf32, #tpu.memory_space<vmem>>, vector<1x1x32xf32>
    %166 = vector.shape_cast %165 : vector<1x1x32xf32> to vector<1x32xf32>
    %167 = vector.shape_cast %166 : vector<1x32xf32> to vector<1x1x32xf32>
    %168 = vector.broadcast %167 : vector<1x1x32xf32> to vector<2x8x32xf32>
    %169 = arith.mulf %164, %168 : vector<2x8x32xf32>
    %c0_66 = arith.constant 0 : index
    %c0_67 = arith.constant 0 : index
    %c0_68 = arith.constant 0 : index
    %170 = vector.load %arg14[%c0_66, %c0_67, %c0_68] : memref<1x1x32xf32, #tpu.memory_space<vmem>>, vector<1x1x32xf32>
    %171 = vector.shape_cast %170 : vector<1x1x32xf32> to vector<1x32xf32>
    %172 = vector.shape_cast %171 : vector<1x32xf32> to vector<1x1x32xf32>
    %173 = vector.broadcast %172 : vector<1x1x32xf32> to vector<2x8x32xf32>
    %174 = arith.addf %169, %173 : vector<2x8x32xf32>
    %c0_69 = arith.constant 0 : index
    %c0_70 = arith.constant 0 : index
    %c0_71 = arith.constant 0 : index
    %175 = vector.load %arg16[%c0_69, %c0_70, %c0_71] : memref<2x8x32xf32, #tpu.memory_space<vmem>>, vector<2x8x32xf32>
    tpu.vector_store %arg16[%c0_69, %c0_70, %c0_71], %174 {strides = array<i32>} : memref<2x8x32xf32, #tpu.memory_space<vmem>>, vector<2x8x32xf32>,
    %c1_i32 = arith.constant 1 : i32
    %176 = arith.cmpi eq, %arg1, %c1_i32 : i32
    %177 = arith.extui %176 : i1 to i32
    %c0_i32_72 = arith.constant 0 : i32
    %178 = arith.cmpi ne, %177, %c0_i32_72 : i32
    scf.if %178 {
      %c0_73 = arith.constant 0 : index
      %c0_74 = arith.constant 0 : index
      %c0_75 = arith.constant 0 : index
      %179 = vector.load %arg15[%c0_73, %c0_74, %c0_75] : memref<2x8x32xf32, #tpu.memory_space<vmem>>, vector<2x8x32xf32>
      tpu.vector_store %arg15[%c0_73, %c0_74, %c0_75], %174 {strides = array<i32>} : memref<2x8x32xf32, #tpu.memory_space<vmem>>, vector<2x8x32xf32>,
    } else {
    }
    return
  }
  func.func @transform_0(%arg0: i32, %arg1: i32) -> (i32, i32, i32) {
    %c0_i32 = arith.constant 0 : i32
    %c0_i32_0 = arith.constant 0 : i32
    %c0_i32_1 = arith.constant 0 : i32
    return %arg0, %c0_i32, %c0_i32_0 : i32, i32, i32
  }
  func.func @transform_1(%arg0: i32, %arg1: i32) -> (i32, i32, i32) {
    %c0_i32 = arith.constant 0 : i32
    %c0_i32_0 = arith.constant 0 : i32
    %c0_i32_1 = arith.constant 0 : i32
    return %arg1, %c0_i32, %c0_i32_0 : i32, i32, i32
  }
  func.func @transform_2(%arg0: i32, %arg1: i32) -> (i32, i32, i32) {
    %c0_i32 = arith.constant 0 : i32
    %c0_i32_0 = arith.constant 0 : i32
    %c0_i32_1 = arith.constant 0 : i32
    return %arg1, %c0_i32, %c0_i32_0 : i32, i32, i32
  }
  func.func @transform_3(%arg0: i32, %arg1: i32) -> (i32, i32, i32) {
    %c0_i32 = arith.constant 0 : i32
    %c0_i32_0 = arith.constant 0 : i32
    %c0_i32_1 = arith.constant 0 : i32
    return %arg1, %c0_i32, %c0_i32_0 : i32, i32, i32
  }
  func.func @transform_4(%arg0: i32, %arg1: i32) -> (i32, i32, i32) {
    %c0_i32 = arith.constant 0 : i32
    %c0_i32_0 = arith.constant 0 : i32
    %c0_i32_1 = arith.constant 0 : i32
    return %arg1, %c0_i32, %c0_i32_0 : i32, i32, i32
  }
  func.func @transform_5(%arg0: i32, %arg1: i32) -> (i32, i32, i32) {
    %c0_i32 = arith.constant 0 : i32
    %c0_i32_0 = arith.constant 0 : i32
    %c0_i32_1 = arith.constant 0 : i32
    return %arg1, %c0_i32, %c0_i32_0 : i32, i32, i32
  }
  func.func @transform_6(%arg0: i32, %arg1: i32) -> (i32, i32, i32) {
    %c0_i32 = arith.constant 0 : i32
    %c0_i32_0 = arith.constant 0 : i32
    %c0_i32_1 = arith.constant 0 : i32
    return %arg1, %c0_i32, %c0_i32_0 : i32, i32, i32
  }
  func.func @transform_7(%arg0: i32, %arg1: i32) -> (i32, i32, i32) {
    %c0_i32 = arith.constant 0 : i32
    %c0_i32_0 = arith.constant 0 : i32
    %c0_i32_1 = arith.constant 0 : i32
    return %arg1, %c0_i32, %c0_i32_0 : i32, i32, i32
  }
  func.func @transform_8(%arg0: i32, %arg1: i32) -> (i32, i32, i32) {
    %c0_i32 = arith.constant 0 : i32
    %c0_i32_0 = arith.constant 0 : i32
    %c0_i32_1 = arith.constant 0 : i32
    return %arg1, %c0_i32, %c0_i32_0 : i32, i32, i32
  }
  func.func @transform_9(%arg0: i32, %arg1: i32) -> (i32, i32, i32) {
    %c0_i32 = arith.constant 0 : i32
    %c0_i32_0 = arith.constant 0 : i32
    %c0_i32_1 = arith.constant 0 : i32
    return %arg1, %c0_i32, %c0_i32_0 : i32, i32, i32
  }
  func.func @transform_10(%arg0: i32, %arg1: i32) -> (i32, i32, i32) {
    %c0_i32 = arith.constant 0 : i32
    %c0_i32_0 = arith.constant 0 : i32
    %c0_i32_1 = arith.constant 0 : i32
    return %arg1, %c0_i32, %c0_i32_0 : i32, i32, i32
  }
  func.func @transform_11(%arg0: i32, %arg1: i32) -> (i32, i32, i32) {
    %c0_i32 = arith.constant 0 : i32
    %c0_i32_0 = arith.constant 0 : i32
    %c0_i32_1 = arith.constant 0 : i32
    return %arg1, %c0_i32, %c0_i32_0 : i32, i32, i32
  }
  func.func @transform_12(%arg0: i32, %arg1: i32) -> (i32, i32, i32) {
    %c0_i32 = arith.constant 0 : i32
    %c0_i32_0 = arith.constant 0 : i32
    %c0_i32_1 = arith.constant 0 : i32
    return %arg1, %c0_i32, %c0_i32_0 : i32, i32, i32
  }
  func.func @transform_13(%arg0: i32, %arg1: i32) -> (i32, i32, i32) {
    %c0_i32 = arith.constant 0 : i32
    %c0_i32_0 = arith.constant 0 : i32
    %c0_i32_1 = arith.constant 0 : i32
    return %arg0, %c0_i32, %c0_i32_0 : i32, i32, i32
  }
}

</mosaic_0001>

<bundles_post_ra>
// kernel: tpu_custom_call.1
= control target key start
LH: loop header
LB: loop body
LE: loop exit
PB: predicated region body
PF: predicated region fallthrough
CT: control target
= control target key end

     0   :  { %s3552_s0 = inlined_call_operand.hbm [shape: f32[2,8,32], index: 0, kind: input, shape index: {}]   ;;  %s3553_s1 = inlined_call_operand.vmem [shape: bf16[2,32,96], index: 1, kind: input, shape index: {}]   ;;  %s3554_s2 = inlined_call_operand.vmem [shape: f32[2,1,96], index: 2, kind: input, shape index: {}]   ;;  %s3555_s3 = inlined_call_operand.vmem [shape: bf16[2,32,32], index: 3, kind: input, shape index: {}]   ;;  %s3556_s4 = inlined_call_operand.hbm [shape: f32[2,1,32], index: 4, kind: input, shape index: {}]   ;;  %s3557_s5 = inlined_call_operand.hbm [shape: f32[2,1,32], index: 5, kind: input, shape index: {}]   ;;  %s3558_s6 = inlined_call_operand.hbm [shape: f32[2,1,32], index: 6, kind: input, shape index: {}]   ;;  %s3559_s7 = inlined_call_operand.vmem [shape: bf16[2,32,64], index: 7, kind: input, shape index: {}]   ;;  %s3560_s8 = inlined_call_operand.hbm [shape: f32[2,1,64], index: 8, kind: input, shape index: {}]   ;;  %s3561_s9 = inlined_call_operand.vmem [shape: bf16[2,64,32], index: 9, kind: input, shape index: {}]   ;;  %s3562_s10 = inlined_call_operand.vmem [shape: f32[2,1,32], index: 10, kind: input, shape index: {}]   ;;  %s3563_s11 = inlined_call_operand.vmem [shape: f32[2,1,32], index: 11, kind: input, shape index: {}]   ;;  %s3564_s12 = inlined_call_operand.vmem [shape: f32[2,1,32], index: 12, kind: input, shape index: {}]   ;;  %s3565_s13 = inlined_call_operand.hbm [shape: f32[2,8,32], index: 13, kind: output, shape index: {}]  }
   0x1   :  { %3578 = sst [smem:[#allocation22_spill]] %s3552_s0 }
   0x2   :  { %3579 = sst [smem:[#allocation23_spill]] %s3553_s1 }
   0x3   :  { %3580 = sst [smem:[#allocation24_spill]] %s3555_s3 }
   0x4   :  { %3581 = sst [smem:[#allocation25_spill]] %s3556_s4 }
   0x5   :  { %3582 = sst [smem:[#allocation26_spill]] %s3558_s6 }
   0x6   :  { %3583 = sst [smem:[#allocation27_spill]] %s3559_s7 }
   0x7   :  { %3584 = sst [smem:[#allocation28_spill]] %s3561_s9 }
   0x8   :  { %3585 = sst [smem:[#allocation29_spill]] %s3562_s10 }
   0x9   :  { %3586 = sst [smem:[#allocation30_spill]] %s3563_s11 }
   0xa   :  { %3587 = sst [smem:[#allocation31_spill]] %s3564_s12 }
   0xb   :  { %3588 = sst [smem:[#allocation32_spill]] %s3565_s13 }
   0xc   :  { %18 = vsyncpa [#allocation4], 0 }
   0xd   :  { %19 = vsyncpa [#allocation7], 0 }
   0xe   :  { %21 = vsyncpa [#allocation7 + $0x1], 0 }
   0xf   :  { %22 = vsyncpa [#allocation10], 0 }
  0x10   :  { %24 = vsyncpa [#allocation10 + $0x1], 0 }
  0x11   :  { %25 = vsyncpa [#allocation5], 0  ;;  %s3005_s25 = smov 0   ;;  %s3007_s26 = smov 0  }
  0x12   :  { %s3009_s27 = smov 0   ;;  %s3011_s28 = smov 0  }
  0x13   :  { %s3013_s29 = smov 0   ;;  %s3015_s30 = smov 0  }
  0x14 LB: > { %3589 = sst [smem:[#allocation17_spill]] %s2896_s27  ;;  %s40_s14 = sadd.s32 1, %s2904_s29  ;;  %s2908_s30 = sphi %s3015_s30, %s31_s30   ;;  %s2904_s29 = sphi %s3013_s29, %s3631_s29   ;;  %s2900_s28 = sphi %s3011_s28, %s3630_s28   ;;  %s2896_s27 = sphi %s3009_s27, %s3629_s27   ;;  %s2892_s26 = sphi %s3007_s26, %s3633_s26   ;;  %s2888_s25 = sphi %s3005_s25, %s3632_s25  }
  0x15   : > { %3590 = sst [smem:[#allocation18_spill]] %s2904_s29  ;;  %s154_s15 = sadd.s32 1, %s2896_s27 }
  0x16   : > { %3591 = sst [smem:[#allocation19_spill]] %s2908_s30  ;;  %p41_p0 = scmp.ge.s32.totalorder %s40_s14, 2 }
  0x17   : > { %p161_p1 = scmp.ne.s32.totalorder %s2896_s27, %s2892_s26  ;;  %p162_p2 = scmp.eq.s32.totalorder %s2908_s30, 0 }
  0x18   : > { %s3635_s14 = smov (%p41_p0, %s40_s14), 0  ;;  %p2534_p4 = scmp.lt.s32.totalorder %s2908_s30, 2 }
  0x19   : > { %3592 = sst [smem:[#allocation20_spill]] %s3635_s14  ;;  %p163_p3 = por %p162_p2, %p161_p1 }
  0x1a   : > { %s151_s16 = ssub.s32 %s2904_s29, %s3635_s14  ;;  %s3047_s18 = sand.u32 1, %s2896_s27  }
  0x1b   : > { %p152_p5 = scmp.eq.s32.totalorder %s151_s16, 0  ;;  %s3050_s19 = sshll.u32 %s2904_s29, 4 }
  0x1c   : > { %s3594_s4 = sld [smem:[#allocation25_spill]]  ;;  %s466_s24 = scalar_lea.vmem [#allocation6], %s3047_s18 }
  0x1d   : > { %s3053_s20 = scalar_select %p152_p5, %s2896_s27, %s154_s15  }
  0x1e   : > { %s473_s17 = sshll.u32 %s466_s24, 4  ;;  %p3062_p6 = pnand %p2534_p4, %p163_p3  ;;  %s3066_s17 = int_to_ptr.vmem [resolvable:$true] %s473_s17 }
  0x1f   : > { %3593 = sst [smem:[#allocation21_spill]] %s3053_s20  ;;  %s3596_s15 = sand.u32 1, %s2908_s30  }
  0x20   : > { %s3595_s16 = scalar_select %p3062_p6, 1, 0 }
  0x21   : > { %s3070_s14 = scalar_lea.sflag [#allocation7], %s3596_s15  ;;  %p3076_p8 = pneg %p3062_p6 }
  0x22   : > { %s3059_s23 = scalar_lea.hbm %s3594_s4, %s3050_s19  ;;  %s2677_s20 = scalar_lea.hbm %s3594_s4, 32 }
  0x23   : > { %s2672_s29 = scalar_lea.hbm %s3059_s23, 16  ;;  %p2678_p11 = scmp.lt.u32.totalorder %s3059_s23, %s3594_s4 }
  0x24   : > { %p2673_p7 = scmp.ne.s32.totalorder %s3059_s23, %s2672_s29  ;;  %p2679_p12 = scmp.lt.u32.totalorder %s2677_s20, %s2672_s29 }
  0x25   : > { %s3597_s21 = scalar_select %p3076_p8, 1, 0 }
  0x26   : > { %p2675_p9 = pnand %p3076_p8, %p2673_p7  ;;  %p2680_p13 = por %p2679_p12, %p2678_p11 }
  0x27   : > { %p2681_p0 = scmp.lt.u32.totalorder %s2672_s29, %s3059_s23 }
  0x28   : > { %p2676_p10 = pneg %p2675_p9 }
  0x29   : > { %p2682_p1 = por %p2681_p0, %p2680_p13 }
  0x2b   : > { %p2683_p2 = pnand %p2682_p1, %p2676_p10 }
  0x2d   : > { %2686 = shalt.err (!%p2683_p2)
}
  0x2e   : > { %s2687_s15 = scalar_lea.vmem %s3066_s17, 16  ;;  %s2910_s22 = smov [#allocation6]  }
  0x2f   : > { %p2688_p3 = scmp.ne.s32.totalorder %s3066_s17, %s2687_s15  ;;  %s2692_s24 = sshll.u32 %s2910_s22, 4  ;;  %s2693_s24 = int_to_ptr.vmem [resolvable:$false] %s2692_s24 }
  0x30   : > { %s2694_s13 = scalar_lea.vmem %s2693_s24, 32  ;;  %p2695_p7 = scmp.lt.s32.totalorder %s3066_s17, %s2693_s24 }
  0x31   : > { %p2690_p4 = pnand %p2688_p3, %p3076_p8  ;;  %p2696_p9 = scmp.lt.s32.totalorder %s2694_s13, %s2687_s15 }
  0x33   : > { %p2691_p5 = pneg %p2690_p4  ;;  %p2697_p11 = por %p2696_p9, %p2695_p7 }
  0x35   : > { %p2698_p12 = pnand %p2697_p11, %p2691_p5 }
  0x37   : > { %2701 = shalt.err (!%p2698_p12)
}
  0x38   : > { %2523 = dma.hbm_to_vmem [thread:$0]  (!%p3062_p6), %s3059_s23, 16, %s3066_s17, %s3070_s14  }
  0x39   : > { %s3598_s6 = sld [smem:[#allocation26_spill]]  ;;  %s500_s15 = scalar_lea.vmem [#allocation9], %s3047_s18 }
  0x3a   : > { %s507_s22 = sshll.u32 %s500_s15, 4  ;;  %s3599_s24 = sand.u32 1, %s2908_s30   ;;  %s508_s22 = int_to_ptr.vmem [resolvable:$true] %s507_s22 }
  0x3b   : > { %s3109_s13 = scalar_lea.sflag [#allocation10], %s3599_s24 }
  0x3f   : > { %s3104_s20 = scalar_lea.hbm %s3598_s6, %s3050_s19  ;;  %s2707_s27 = scalar_lea.hbm %s3598_s6, 32 }
  0x40   : > { %s2702_s4 = scalar_lea.hbm %s3104_s20, 16  ;;  %p2708_p1 = scmp.lt.u32.totalorder %s3104_s20, %s3598_s6 }
  0x41   : > { %p2703_p10 = scmp.ne.s32.totalorder %s3104_s20, %s2702_s4  ;;  %p2709_p2 = scmp.lt.u32.totalorder %s2707_s27, %s2702_s4 }
  0x42   : > { %p2711_p4 = scmp.lt.u32.totalorder %s2702_s4, %s3104_s20 }
  0x43   : > { %p2705_p13 = pnand %p2703_p10, %p3076_p8  ;;  %p2710_p3 = por %p2709_p2, %p2708_p1 }
  0x45   : > { %p2706_p0 = pneg %p2705_p13  ;;  %p2712_p5 = por %p2711_p4, %p2710_p3 }
  0x47   : > { %p2713_p7 = pnand %p2712_p5, %p2706_p0 }
  0x49   : > { %2716 = shalt.err (!%p2713_p7)
}
  0x4a   : > { %s2717_s15 = scalar_lea.vmem %s508_s22, 16  ;;  %s2911_s24 = smov [#allocation9]  }
  0x4b   : > { %p2718_p9 = scmp.ne.s32.totalorder %s508_s22, %s2717_s15  ;;  %s2722_s11 = sshll.u32 %s2911_s24, 4  ;;  %s2723_s11 = int_to_ptr.vmem [resolvable:$false] %s2722_s11 }
  0x4c   : > { %s2724_s17 = scalar_lea.vmem %s2723_s11, 32  ;;  %p2725_p10 = scmp.lt.s32.totalorder %s508_s22, %s2723_s11 }
  0x4d   : > { %p2720_p11 = pnand %p2718_p9, %p3076_p8  ;;  %p2726_p13 = scmp.lt.s32.totalorder %s2724_s17, %s2717_s15 }
  0x4f   : > { %p2721_p12 = pneg %p2720_p11  ;;  %p2727_p6 = por %p2726_p13, %p2725_p10 }
  0x51   : > { %p2728_p1 = pnand %p2727_p6, %p2721_p12 }
  0x53   : > { %2731 = shalt.err (!%p2728_p1)
}
  0x54   : > { %p3600_p2 = scmp.ne.s32.totalorder %s3595_s16, 0  ;;  %s3130_s4 = sadd.s32 4294967295, %s2908_s30  }
  0x55   : > { %p167_p0 = scmp.ne.s32.totalorder %s2892_s26, %s2888_s25  ;;  %p3573_p6 = scmp.eq.s32.totalorder %s3130_s4, 0 }
  0x56   : > { %2529 = dma.hbm_to_vmem [thread:$0]  (!%p3600_p2), %s3104_s20, 16, %s508_s22, %s3109_s13  }
  0x57   : > { %p2257_p3 = scmp.ge.s32.totalorder %s2908_s30, 1  ;;  %p412_p4 = scmp.lt.s32.totalorder %s2908_s30, 3 }
  0x58   : > { %p3139_p5 = por %p3573_p6, %p167_p0  ;;  %s2912_s20 = smov [#allocation3]  }
  0x59   : > { %p3143_p7 = pnand %p2257_p3, %p412_p4  ;;  %s427_s22 = sshll.u32 %s2912_s20, 4  ;;  %s428_s22 = int_to_ptr.vmem [resolvable:$true] %s427_s22 }
  0x5a   : > { %s3601_s11 = scalar_select %p3139_p5, 1, 0 }
  0x5b   : > { %s3602_s12 = scalar_select %p3143_p7, 1, 0 }
  0x5c   : > { %p2516_p9 = pneg %p3143_p7  ;;  %s3159_s29 = scalar_lea.hbm %s3557_s5, %s3050_s19 }
  0x5d   : > { %s483_s15 = scalar_lea.vmem [#allocation8], %s3047_s18  ;;  %s3604_s0 = sld [smem:[#allocation22_spill]] }
  0x5e   : > { %p3151_p11 = pnand %p2516_p9, %p3573_p6  ;;  %s490_s24 = sshll.u32 %s483_s15, 4  ;;  %s3162_s24 = int_to_ptr.vmem [resolvable:$true] %s490_s24 }
  0x60   : > { %p2734_p10 = pneg %p3151_p11 }
  0x63   : > { %s2732_s6 = scalar_lea.hbm %s3604_s0, 256 }
  0x64   : > { %p2733_p12 = scmp.ne.s32.totalorder %s3604_s0, %s2732_s6  ;;  %p2739_p0 = scmp.lt.u32.totalorder %s2732_s6, %s3604_s0 }
  0x66   : > { %p2735_p13 = pnand %p2734_p10, %p2733_p12 }
  0x68   : > { %p2736_p1 = pneg %p2735_p13 }
  0x6a   : > { %p2741_p3 = pnand %p2739_p0, %p2736_p1 }
  0x6c   : > { %2744 = shalt.err (!%p2741_p3)
}
  0x6d   : > { %s2745_s15 = scalar_lea.vmem %s428_s22, 256  ;;  %p2753_p5 = scmp.lt.s32.totalorder %s428_s22, %s428_s22 }
  0x6e   : > { %p2746_p4 = scmp.ne.s32.totalorder %s428_s22, %s2745_s15  ;;  %p2754_p7 = scmp.lt.s32.totalorder %s2745_s15, %s2745_s15 }
  0x70   : > { %p2748_p9 = pnand %p2746_p4, %p2734_p10  ;;  %p2755_p2 = por %p2754_p7, %p2753_p5 }
  0x72   : > { %p2749_p6 = pneg %p2748_p9 }
  0x74   : > { %p2756_p8 = pnand %p2755_p2, %p2749_p6 }
  0x76   : > { %2759 = shalt.err (!%p2756_p8)
}
  0x77   : > { %s2913_s10 = smov 128   ;;  %s2914_s30 = smov 8  }
  0x78   : > { %2519 = dma.hbm_to_vmem [thread:$0]  (!%p3151_p11), %s3604_s0, 256, %s428_s22, [#allocation4], %s2913_s10, %s2913_s10, %s2914_s30  }
  0x79   : > { %s2760_s20 = scalar_lea.hbm %s3159_s29, 16  ;;  %p3605_p10 = scmp.ne.s32.totalorder %s3597_s21, 0 }
  0x7a   : > { %p2761_p12 = scmp.ne.s32.totalorder %s3159_s29, %s2760_s20  ;;  %s2765_s15 = scalar_lea.hbm %s3557_s5, 32 }
  0x7b   : > { %p2766_p8 = scmp.lt.u32.totalorder %s3159_s29, %s3557_s5  ;;  %p2767_p2 = scmp.lt.u32.totalorder %s2765_s15, %s2760_s20 }
  0x7c   : > { %p2763_p13 = pnand %p2761_p12, %p3605_p10  ;;  %p2769_p7 = scmp.lt.u32.totalorder %s2760_s20, %s3159_s29 }
  0x7d   : > { %p2768_p6 = por %p2767_p2, %p2766_p8 }
  0x7e   : > { %p2764_p5 = pneg %p2763_p13 }
  0x7f   : > { %p2770_p1 = por %p2769_p7, %p2768_p6 }
  0x81   : > { %p2771_p0 = pnand %p2770_p1, %p2764_p5 }
  0x83   : > { %2774 = shalt.err (!%p2771_p0)
}
  0x84   : > { %s2775_s22 = scalar_lea.vmem %s3162_s24, 16  ;;  %s2915_s25 = smov [#allocation8]  }
  0x85   : > { %p2776_p11 = scmp.ne.s32.totalorder %s3162_s24, %s2775_s22  ;;  %s2780_s10 = sshll.u32 %s2915_s25, 4  ;;  %s2781_s10 = int_to_ptr.vmem [resolvable:$false] %s2780_s10 }
  0x86   : > { %s2782_s7 = scalar_lea.vmem %s2781_s10, 32  ;;  %p2783_p9 = scmp.lt.s32.totalorder %s3162_s24, %s2781_s10 }
  0x87   : > { %p2778_p3 = pnand %p2776_p11, %p3605_p10  ;;  %p2784_p12 = scmp.lt.s32.totalorder %s2782_s7, %s2775_s22 }
  0x89   : > { %p2779_p4 = pneg %p2778_p3  ;;  %p2785_p13 = por %p2784_p12, %p2783_p9 }
  0x8b   : > { %p2786_p8 = pnand %p2785_p13, %p2779_p4 }
  0x8d   : > { %2789 = shalt.err (!%p2786_p8)
}
  0x8e   : > { %p3606_p5 = scmp.ne.s32.totalorder %s3595_s16, 0  ;;  %s3206_s6 = scalar_lea.hbm %s3560_s8, %s3050_s19 }
  0x8f   : > { %s525_s17 = scalar_lea.vmem [#allocation11], %s3047_s18  ;;  %s2790_s23 = scalar_lea.hbm %s3206_s6, 16 }
  0x90   : > { %2526 = dma.hbm_to_vmem [thread:$0]  (!%p3606_p5), %s3159_s29, 16, %s3162_s24, %s3070_s14  }
  0x91   : > { %s532_s20 = sshll.u32 %s525_s17, 4  ;;  %p2791_p2 = scmp.ne.s32.totalorder %s3206_s6, %s2790_s23  ;;  %s533_s20 = int_to_ptr.vmem [resolvable:$true] %s532_s20 }
  0x92   : > { %s2795_s14 = scalar_lea.hbm %s3560_s8, 32  ;;  %p2796_p1 = scmp.lt.u32.totalorder %s3206_s6, %s3560_s8 }
  0x93   : > { %p2793_p6 = pnand %p2791_p2, %p3605_p10  ;;  %p2797_p0 = scmp.lt.u32.totalorder %s2795_s14, %s2790_s23 }
  0x94   : > { %p2799_p3 = scmp.lt.u32.totalorder %s2790_s23, %s3206_s6 }
  0x95   : > { %p2794_p7 = pneg %p2793_p6  ;;  %p2798_p11 = por %p2797_p0, %p2796_p1 }
  0x97   : > { %p2800_p4 = por %p2799_p3, %p2798_p11 }
  0x99   : > { %p2801_p9 = pnand %p2800_p4, %p2794_p7 }
  0x9b   : > { %2804 = shalt.err (!%p2801_p9)
}
  0x9c   : > { %s2805_s18 = scalar_lea.vmem %s533_s20, 16  ;;  %s2916_s19 = smov [#allocation11]  }
  0x9d   : > { %p2806_p12 = scmp.ne.s32.totalorder %s533_s20, %s2805_s18  ;;  %s2810_s22 = sshll.u32 %s2916_s19, 4  ;;  %s2811_s22 = int_to_ptr.vmem [resolvable:$false] %s2810_s22 }
  0x9e   : > { %s2812_s25 = scalar_lea.vmem %s2811_s22, 32  ;;  %p2813_p2 = scmp.lt.s32.totalorder %s533_s20, %s2811_s22 }
  0x9f   : > { %p2808_p13 = pnand %p2806_p12, %p3605_p10  ;;  %p2814_p6 = scmp.lt.s32.totalorder %s2812_s25, %s2805_s18 }
  0xa1   : > { %p2809_p8 = pneg %p2808_p13  ;;  %p2815_p5 = por %p2814_p6, %p2813_p2 }
  0xa3   : > { %p2816_p0 = pnand %p2815_p5, %p2809_p8 }
  0xa5   : > { %2819 = shalt.err (!%p2816_p0)
}
  0xa6   : > { %p3607_p1 = scmp.ne.s32.totalorder %s3595_s16, 0  ;;  %p3608_p7 = scmp.ne.s32.totalorder %s3602_s12, 0 }
  0xa7   : > { %p3609_p10 = scmp.eq.s32.totalorder (!%p3608_p7), %s3130_s4, 0 }
  0xa8   : > { %2532 = dma.hbm_to_vmem [thread:$0]  (!%p3607_p1), %s3206_s6, 16, %s533_s20, %s3109_s13  }
  0xa9   : > { %567 = sbr.rel (%p3608_p7) target bundleno = 4339 (0x10f3), region = 72 }
  0xb0   : > { %2871 = dma.done.wait (%p3609_p10), [#allocation4], 256   ;;  %p3610_p11 = pmov %p3609_p10 }
  0xb1   : > { %s573_s21 = sand.u32 1, %s3130_s4   ;;  %s3235_s10 = sand.u32 1, %s2892_s26  }
  0xb2   : > { %2873 = vsyncadd (%p3610_p11), [#allocation4], 4294967040  ;;  %s574_s16 = scalar_lea.sflag [#allocation7], %s573_s21  ;;  %p3611_p5 = scmp.ne.s32.totalorder %s3601_s11, 0 }
  0xb4   : > { %2875 = dma.done.wait (%p3611_p5), %s574_s16, 32  }
  0xb5   : > { %2877 = vsyncadd (%p3611_p5), %s574_s16, 4294967264  ;;  %s590_s12 = scalar_lea.sflag [#allocation10], %s573_s21 }
  0xb6   : > { %2879 = dma.done.wait (%p3611_p5), %s590_s12, 32  }
  0xb7   : > { %2881 = vsyncadd (%p3611_p5), %s590_s12, 4294967264  ;;  %p682_p3 = scmp.lt.s32.totalorder %s2900_s28, 1  ;;  %s3612_s1 = sld [smem:[#allocation23_spill]] }
  0xb8   : > { %s3613_s3 = sld [smem:[#allocation24_spill]]  ;;  %s3614_s22 = sld [smem:[#allocation27_spill]] }
  0xb9   : > { %s3250_s30 = scalar_select %p682_p3, %s2900_s28, 1 }
  0xba   : > { %s3615_s9 = sld [smem:[#allocation28_spill]]  ;;  %s3616_s27 = sld [smem:[#allocation29_spill]] }
  0xbb   : > { %s2318_s6 = sshll.u32 %s3250_s30, 4  ;;  %s2321_s21 = sshll.u32 %s3250_s30, 5 }
  0xbc   : > { %s3617_s14 = sld [smem:[#allocation30_spill]]  ;;  %p2274_p4 = scmp.ne.s32.totalorder %s2900_s28, 0 }
  0xbd   : > { %s686_s15 = scalar_lea.vmem %s3612_s1, %s2318_s6  ;;  %v720_v0 = vld [vmem:[#allocation3] sm:$0xff] (!%p2274_p4)  ;;  %vm722_vm0 = vcmask (!%p2274_p4), 261120   ;;  %v721_v1 = vld [vmem:[#allocation3 + $0x8] sm:$0xff] (!%p2274_p4) }
  0xbe   : > { %s3263_s24 = scalar_lea.vmem %s3613_s3, %s2318_s6  ;;  %s3268_s25 = scalar_lea.vmem %s3614_s22, %s2318_s6  ;;  %723 = vst.msk [vmem:[#allocation2] sm:$0xff] (!%p2274_p4), %vm722_vm0, %v720_v0  ;;  %724 = vst.msk [vmem:[#allocation2 + $0x8] sm:$0xff] (!%p2274_p4), %vm722_vm0, %v721_v1 }
  0xbf   : > { %s3618_s3 = sld [smem:[#allocation31_spill]]  ;;  %s600_s6 = scalar_lea.vmem [#allocation11], %s3235_s10 }
  0xc0   : > { %s3274_s17 = scalar_lea.vmem %s3615_s9, %s2321_s21  ;;  %s707_s11 = scalar_lea.vmem %s3616_s27, %s3250_s30 }
  0xc1   : > { %719 = sbr.rel (%p2274_p4) target bundleno = 200 (0xc8), region = 96 }
  0xc2   : > { %s710_s29 = scalar_lea.vmem %s3617_s14, %s3250_s30 }
  0xc5   : > { %s713_s18 = scalar_lea.vmem %s3618_s3, %s3250_s30 }
  0xc8 PF: > { %v2622_v2 = vld [vmem:[%s686_s15] sm:$0xff]   ;;  %v2917_v3 = vmov 0.0   ;;  %v2623_v4 = vld [vmem:[%s686_s15 + $0x8] sm:$0xff]   ;;  %vm2918_vm1 = vmmov 0   ;;  %vm751_vm2 = vcmask 261120   ;;  %s3619_s3 = scalar_lea.vmem %s3554_s2, %s3250_s30  ;;  %s2919_s7 = smov 96  }
  0xc9   : > { %2368 = vmatprep.subr.bf16.mxu0 %v2917_v3  ;;  %2376 = vmatprep.subr.bf16.mxu1 %v2917_v3  ;;  %v3294_v5 = vld [vmem:[#allocation2] sm:$0xff]  ;;  %v3296_v6 = vld [vmem:[#allocation2 + $0x8] sm:$0xff]  ;;  %vm801_vm3 = vcmask 64512   ;;  %s2920_s13 = smov 64   ;;  %s2921_s9 = smov 88   ;;  %vm926_vm4 = vcmask 1043456  }
  0xca   : > { %2369 = vmatpush3.bf16.msra.mxu0 %v2622_v2  ;;  %2372 = vmatprep.mubr.msk.bf16.mxu0 %vm2918_vm1, %v2917_v3  ;;  %v727_v7 = vpack.c.bf16 %v3296_v6, %v3294_v5  ;;  %v2275_v8 = vld [vmem:[%s3619_s3] ss:$0 sm:$0xff]  ;;  %s2922_s23 = smov 120   ;;  %s2923_s15 = smov 56   ;;  %vm1704_vm5 = vcmask 130048   ;;  %vm1707_vm6 = vcmask 195584  }
  0xcb   : > { %2370 = vmatprep.subr.bf16.mxu0 %v2917_v3  ;;  %2378 = vmatprep.mubr.msk.bf16.mxu1 %vm2918_vm1, %v2917_v3  ;;  %s2924_s19 = smov 80   ;;  %s2925_s22 = smov 112   ;;  %vm1935_vm7 = vcmask 523264  }
  0xcc   : > { %s2926_s21 = smov 48   ;;  %s2927_s16 = smov 72  }
  0xcd   : > { %s2928_s12 = smov 104   ;;  %s2929_s20 = smov 40  }
  0xce   : > { %2371 = vmatpush3.bf16.msra.mxu0 %v2623_v4  ;;  %s2930_s27 = smov 8   ;;  %s2931_s14 = smov 16  }
  0xcf   : > { %2382 = vmatprep.subr.bf16.mxu0 %v2917_v3  ;;  %s2932_s0 = smov 24   ;;  %s3622_s1 = scalar_lea.vmem [#allocation9], %s3235_s10 }
  0xd0   : > { %p2313_p9 = scmp.ne.s32.totalorder %s2900_s28, 1 }
  0xd1   : > { %2373 = vmatmul.mubr.msk.bf16.vlgmr.msra.gmra.mrb[0].mxu0 %vm751_vm2, %v727_v7 }
  0xd2   : > { %2384 = vmatprep.mubr.msk.bf16.mxu0 %vm2918_vm1, %v2917_v3 }
 0x1a4   : > { %v789_v9 = vpop.f32.mrb[0].mxu0 }
 0x1a5   : > { %v790_v10 = vadd.f32 %v2275_v8, %v789_v9  ;;  %v2374_v11 = vpop.f32.mrb[1].mxu0 }
 0x1a6   : > { %v792_v12 = vpop.f32.mrb[2].mxu0 }
 0x1a7   : > { %v3312_v13 = vpack.c.bf16 %v790_v10, %v790_v10  ;;  %v793_v14 = vadd.f32 %v2275_v8, %v792_v12  ;;  %v2375_v15 = vpop.f32.mrb[3].mxu0 }
 0x1a9   : > { %799 = vrot.lane.b32.xlu0 %v3312_v13, %s2919_s7  ;;  %v3315_v16 = vpack.c.bf16 %v793_v14, %v793_v14 }
 0x1ad   : > { %849 = vrot.lane.b32.xlu0 %v3315_v16, %s2919_s7 }
 0x21b   : > { %v800_v17 = vpop.permute.xlu0 %799 }
 0x21c   : > { %v806_v18 = vsel %vm801_vm3, %v800_v17, 0 }
 0x21d   : > { %2377 = vmatpush3.bf16.xpose.msra.mxu1 %v806_v18 }
 0x21e   : > { %2388 = vmatprep.subr.bf16.mxu1 %v2917_v3 }
 0x21f   : > { %v850_v19 = vpop.permute.xlu0 %849 }
 0x220   : > { %v855_v20 = vsel %vm801_vm3, %v850_v19, 0 }
 0x221   : > { %2383 = vmatpush3.bf16.xpose.msra.mxu0 %v855_v20 }
 0x222   : > { %2394 = vmatprep.subr.bf16.mxu0 %v2917_v3 }
 0x224   : > { %2379 = vmatmul.mubr.msk.bf16.vlgmr.msra.gmra.mrb[0].mxu1 %vm801_vm3, %v3312_v13 }
 0x225   : > { %2390 = vmatprep.mubr.msk.bf16.mxu1 %vm2918_vm1, %v2917_v3 }
 0x228   : > { %2385 = vmatmul.mubr.msk.bf16.vlgmr.msra.gmra.mrb[4].mxu0 %vm801_vm3, %v3315_v16 }
 0x229   : > { %2396 = vmatprep.mubr.msk.bf16.mxu0 %vm2918_vm1, %v2917_v3 }
 0x2f7   : > { %v842_v21 = vpop.f32.mrb[0].mxu1 }
 0x2f8   : > { %v2380_v22 = vpop.f32.mrb[1].mxu1  ;;  %v897_v23 = vsel %vm801_vm3, %v842_v21, -inf }
 0x2f9   : > { %898 = vmax.xlane.f32.xlu1 %v897_v23  ;;  %v845_v24 = vpop.f32.mrb[2].mxu1 }
 0x2fa   : > { %v2381_v25 = vpop.f32.mrb[3].mxu1 }
 0x2fb   : > { %v891_v26 = vpop.f32.mrb[4].mxu0 }
 0x2fc   : > { %v2386_v27 = vpop.f32.mrb[5].mxu0  ;;  %v900_v28 = vsel %vm801_vm3, %v891_v26, -inf }
 0x2fd   : > { %901 = vmax.xlane.f32.xlu1 %v900_v28  ;;  %v894_v29 = vpop.f32.mrb[6].mxu0 }
 0x2fe   : > { %v2387_v30 = vpop.f32.mrb[7].mxu0 }
 0x30e   : > { %921 = vrot.lane.b32.xlu1 %v3312_v13, %s2920_s13 }
 0x312   : > { %970 = vrot.lane.b32.xlu1 %v3315_v16, %s2920_s13 }
 0x316   : > { %1020 = vrot.lane.b32.xlu1 %v3312_v13, %s2921_s9 }
 0x386   : > { %v899_v31 = vpop.xlane.xlu1 %898 }
 0x387   : > { %v903_v32 = vsub.f32 %v842_v21, %v899_v31 }
 0x389   : > { %v905_v33 = vmul.f32 1.442695, %v903_v32 }
 0x38a   : > { %v902_v34 = vpop.xlane.xlu1 %901 }
 0x38b   : > { %2632 = vpow2.f32 %v905_v33  ;;  %v904_v35 = vsub.f32 %v891_v26, %v902_v34 }
 0x38d   : > { %v907_v36 = vmul.f32 1.442695, %v904_v35 }
 0x38e   : > { %v922_v37 = vpop.permute.xlu1 %921 }
 0x38f   : > { %2634 = vpow2.f32 %v907_v36  ;;  %v928_v38 = vsel %vm926_vm4, %v922_v37, 0 }
 0x390   : > { %2389 = vmatpush3.bf16.msra.mxu1 %v928_v38 }
 0x391   : > { %2400 = vmatprep.subr.bf16.mxu1 %v2917_v3 }
 0x392   : > { %v971_v39 = vpop.permute.xlu1 %970 }
 0x393   : > { %v976_v40 = vsel %vm926_vm4, %v971_v39, 0 }
 0x394   : > { %2395 = vmatpush3.bf16.msra.mxu0 %v976_v40 }
 0x395   : > { %v2633_v41 = vpop.eup %2632  ;;  %2406 = vmatprep.subr.bf16.mxu0 %v2917_v3 }
 0x396   : > { %v909_v42 = vsel %vm801_vm3, %v2633_v41, 0.0  ;;  %v1021_v45 = vpop.permute.xlu1 %1020 }
 0x397   : > { %910 = vadd.xlane.f32.xlu0 %v909_v42  ;;  %v1026_v52 = vsel %vm801_vm3, %v1021_v45, 0 }
 0x399   : > { %v2635_v43 = vpop.eup %2634 }
 0x39a   : > { %v912_v44 = vsel %vm801_vm3, %v2635_v43, 0.0 }
 0x39b   : > { %913 = vadd.xlane.f32.xlu1 %v912_v44 }
 0x3ac   : > { %1070 = vrot.lane.b32.xlu1 %v3315_v16, %s2921_s9 }
 0x3ad   : > { %1018 = vrot.lane.b32.xlu0 %v3312_v13, %s2922_s23 }
 0x3b0   : > { %1068 = vrot.lane.b32.xlu1 %v3315_v16, %s2922_s23 }
 0x424   : > { %v911_v46 = vpop.xlane.xlu0 %910 }
 0x425   : > { %2636 = vrcp.f32 %v911_v46 }
 0x428   : > { %v914_v47 = vpop.xlane.xlu1 %913  ;;  %v1019_v57 = vpop.permute.xlu0 %1018 }
 0x429   : > { %2638 = vrcp.f32 %v914_v47 }
 0x42c   : > { %v1071_v54 = vpop.permute.xlu1 %1070 }
 0x42d   : > { %v1076_v56 = vsel %vm801_vm3, %v1071_v54, 0 }
 0x42f   : > { %v2637_v48 = vpop.eup %2636 }
 0x430   : > { %v917_v49 = vmul.f32 %v2637_v48, %v2633_v41  ;;  %v1069_v58 = vpop.permute.xlu1 %1068 }
 0x432   : > { %v919_v50 = vpack.c.bf16 %v917_v49, %v917_v49 }
 0x433   : > { %v2639_v51 = vpop.eup %2638 }
 0x434   : > { %v918_v53 = vmul.f32 %v2639_v51, %v2635_v43  ;;  %2391 = vmatmul.mubr.msk.bf16.vlgmr.msra.gmra.mrb[4].mxu1 %vm801_vm3, %v919_v50 }
 0x435   : > { %2401 = vmatpush3.bf16.xpose.msra.mxu1 %v1026_v52  ;;  %2402 = vmatprep.mubr.msk.bf16.mxu1 %vm2918_vm1, %v2917_v3 }
 0x436   : > { %v920_v55 = vpack.c.bf16 %v918_v53, %v918_v53  ;;  %2412 = vmatprep.subr.bf16.mxu1 %v2917_v3 }
 0x438   : > { %2397 = vmatmul.mubr.msk.bf16.vlgmr.msra.gmra.mrb[8].mxu0 %vm801_vm3, %v920_v55 }
 0x439   : > { %2407 = vmatpush3.bf16.xpose.msra.mxu0 %v1076_v56  ;;  %2408 = vmatprep.mubr.msk.bf16.mxu0 %vm2918_vm1, %v2917_v3 }
 0x43a   : > { %2418 = vmatprep.subr.bf16.mxu0 %v2917_v3 }
 0x43c   : > { %2403 = vmatmul.mubr.msk.bf16.vlgmr.msra.gmra.mrb[8].mxu1 %vm801_vm3, %v1019_v57 }
 0x43d   : > { %2414 = vmatprep.mubr.msk.bf16.mxu1 %vm2918_vm1, %v2917_v3 }
 0x440   : > { %2409 = vmatmul.mubr.msk.bf16.vlgmr.msra.gmra.mrb[12].mxu0 %vm801_vm3, %v1069_v58 }
 0x441   : > { %2420 = vmatprep.mubr.msk.bf16.mxu0 %vm2918_vm1, %v2917_v3 }
 0x507   : > { %v3360_v59 = vpop.f32.mrb[4].mxu1 }
 0x508   : > { %v2392_v60 = vpop.f32.mrb[5].mxu1 }
 0x509   : > { %v967_v61 = vpop.f32.mrb[6].mxu1 }
 0x50a   : > { %v2393_v62 = vpop.f32.mrb[7].mxu1 }
 0x50b   : > { %v3362_v63 = vpop.f32.mrb[8].mxu0 }
 0x50c   : > { %v2398_v0 = vpop.f32.mrb[9].mxu0 }
 0x50d   : > { %v1015_v1 = vpop.f32.mrb[10].mxu0 }
 0x50e   : > { %v2399_v2 = vpop.f32.mrb[11].mxu0 }
 0x50f   : > { %v1062_v4 = vpop.f32.mrb[8].mxu1 }
 0x510   : > { %v2404_v7 = vpop.f32.mrb[9].mxu1  ;;  %v1118_v8 = vsel %vm801_vm3, %v1062_v4, -inf }
 0x511   : > { %1119 = vmax.xlane.f32.xlu1 %v1118_v8  ;;  %v1065_v9 = vpop.f32.mrb[10].mxu1 }
 0x512   : > { %v2405_v10 = vpop.f32.mrb[11].mxu1 }
 0x513   : > { %v1112_v11 = vpop.f32.mrb[12].mxu0 }
 0x514   : > { %v2410_v12 = vpop.f32.mrb[13].mxu0  ;;  %v1121_v14 = vsel %vm801_vm3, %v1112_v11, -inf }
 0x515   : > { %1122 = vmax.xlane.f32.xlu0 %v1121_v14  ;;  %v1115_v15 = vpop.f32.mrb[14].mxu0 }
 0x516   : > { %v2411_v17 = vpop.f32.mrb[15].mxu0 }
 0x522   : > { %1142 = vrot.lane.b32.xlu1 %v3312_v13, %s2923_s15 }
 0x526   : > { %1240 = vrot.lane.b32.xlu1 %v3312_v13, %s2924_s19 }
 0x52b   : > { %1190 = vrot.lane.b32.xlu0 %v3315_v16, %s2923_s15 }
 0x52f   : > { %1238 = vrot.lane.b32.xlu0 %v3312_v13, %s2925_s22 }
 0x59e   : > { %v1120_v18 = vpop.xlane.xlu1 %1119 }
 0x59f   : > { %v1124_v19 = vsub.f32 %v1062_v4, %v1120_v18 }
 0x5a1   : > { %v1126_v20 = vmul.f32 1.442695, %v1124_v19 }
 0x5a2   : > { %v1143_v21 = vpop.permute.xlu1 %1142  ;;  %v1123_v22 = vpop.xlane.xlu0 %1122 }
 0x5a3   : > { %2640 = vpow2.f32 %v1126_v20  ;;  %v1148_v23 = vsel %vm926_vm4, %v1143_v21, 0  ;;  %v1125_v24 = vsub.f32 %v1112_v11, %v1123_v22 }
 0x5a4   : > { %2413 = vmatpush3.bf16.msra.mxu1 %v1148_v23 }
 0x5a5   : > { %v1128_v25 = vmul.f32 1.442695, %v1125_v24  ;;  %2424 = vmatprep.subr.bf16.mxu1 %v2917_v3 }
 0x5a6   : > { %v1191_v26 = vpop.permute.xlu0 %1190  ;;  %v1241_v32 = vpop.permute.xlu1 %1240 }
 0x5a7   : > { %2642 = vpow2.f32 %v1128_v25  ;;  %v1196_v27 = vsel %vm926_vm4, %v1191_v26, 0  ;;  %v1246_v39 = vsel %vm801_vm3, %v1241_v32, 0 }
 0x5a8   : > { %2419 = vmatpush3.bf16.msra.mxu0 %v1196_v27 }
 0x5a9   : > { %2430 = vmatprep.subr.bf16.mxu0 %v2917_v3 }
 0x5aa   : > { %v1239_v44 = vpop.permute.xlu0 %1238 }
 0x5ad   : > { %v2641_v28 = vpop.eup %2640 }
 0x5ae   : > { %v1130_v29 = vsel %vm801_vm3, %v2641_v28, 0.0 }
 0x5af   : > { %1131 = vadd.xlane.f32.xlu1 %v1130_v29 }
 0x5b1   : > { %v2643_v30 = vpop.eup %2642 }
 0x5b2   : > { %v1133_v31 = vsel %vm801_vm3, %v2643_v30, 0.0 }
 0x5b3   : > { %1134 = vadd.xlane.f32.xlu1 %v1133_v31 }
 0x5c4   : > { %1290 = vrot.lane.b32.xlu1 %v3315_v16, %s2924_s19 }
 0x5c8   : > { %1288 = vrot.lane.b32.xlu1 %v3315_v16, %s2925_s22 }
 0x63c   : > { %v1132_v33 = vpop.xlane.xlu1 %1131 }
 0x63d   : > { %2644 = vrcp.f32 %v1132_v33 }
 0x640   : > { %v1135_v34 = vpop.xlane.xlu1 %1134 }
 0x641   : > { %2646 = vrcp.f32 %v1135_v34 }
 0x644   : > { %v1291_v41 = vpop.permute.xlu1 %1290 }
 0x645   : > { %v1296_v43 = vsel %vm801_vm3, %v1291_v41, 0 }
 0x647   : > { %v2645_v35 = vpop.eup %2644 }
 0x648   : > { %v1138_v36 = vmul.f32 %v2645_v35, %v2641_v28  ;;  %v1289_v45 = vpop.permute.xlu1 %1288 }
 0x64a   : > { %v1140_v37 = vpack.c.bf16 %v1138_v36, %v1138_v36 }
 0x64b   : > { %v2647_v38 = vpop.eup %2646 }
 0x64c   : > { %v1139_v40 = vmul.f32 %v2647_v38, %v2643_v30  ;;  %2415 = vmatmul.mubr.msk.bf16.vlgmr.msra.gmra.mrb[12].mxu1 %vm801_vm3, %v1140_v37 }
 0x64d   : > { %2425 = vmatpush3.bf16.xpose.msra.mxu1 %v1246_v39  ;;  %2426 = vmatprep.mubr.msk.bf16.mxu1 %vm2918_vm1, %v2917_v3 }
 0x64e   : > { %v1141_v42 = vpack.c.bf16 %v1139_v40, %v1139_v40  ;;  %2436 = vmatprep.subr.bf16.mxu1 %v2917_v3 }
 0x650   : > { %2421 = vmatmul.mubr.msk.bf16.vlgmr.msra.gmra.mrb[16].mxu0 %vm801_vm3, %v1141_v42 }
 0x651   : > { %2431 = vmatpush3.bf16.xpose.msra.mxu0 %v1296_v43  ;;  %2432 = vmatprep.mubr.msk.bf16.mxu0 %vm2918_vm1, %v2917_v3 }
 0x652   : > { %2442 = vmatprep.subr.bf16.mxu0 %v2917_v3 }
 0x654   : > { %2427 = vmatmul.mubr.msk.bf16.vlgmr.msra.gmra.mrb[16].mxu1 %vm801_vm3, %v1239_v44 }
 0x655   : > { %2438 = vmatprep.mubr.msk.bf16.mxu1 %vm2918_vm1, %v2917_v3 }
 0x658   : > { %2433 = vmatmul.mubr.msk.bf16.vlgmr.msra.gmra.mrb[20].mxu0 %vm801_vm3, %v1289_v45 }
 0x659   : > { %2444 = vmatprep.mubr.msk.bf16.mxu0 %vm2918_vm1, %v2917_v3 }
 0x71f   : > { %v3394_v46 = vpop.f32.mrb[12].mxu1 }
 0x720   : > { %v2416_v47 = vpop.f32.mrb[13].mxu1 }
 0x721   : > { %v1187_v48 = vpop.f32.mrb[14].mxu1 }
 0x722   : > { %v2417_v49 = vpop.f32.mrb[15].mxu1 }
 0x723   : > { %v3396_v50 = vpop.f32.mrb[16].mxu0 }
 0x724   : > { %v2607_v51 = vpack.i.bf16 %v3396_v50, %v3394_v46  ;;  %v2422_v52 = vpop.f32.mrb[17].mxu0 }
 0x725   : > { %v1235_v53 = vpop.f32.mrb[18].mxu0 }
 0x726   : > { %v2423_v54 = vpop.f32.mrb[19].mxu0 }
 0x727   : > { %v1282_v55 = vpop.f32.mrb[16].mxu1 }
 0x728   : > { %v2428_v56 = vpop.f32.mrb[17].mxu1  ;;  %v1338_v57 = vsel %vm801_vm3, %v1282_v55, -inf }
 0x729   : > { %1339 = vmax.xlane.f32.xlu0 %v1338_v57  ;;  %v1285_v58 = vpop.f32.mrb[18].mxu1 }
 0x72a   : > { %v2429_v60 = vpop.f32.mrb[19].mxu1 }
 0x72b   : > { %v1332_v61 = vpop.f32.mrb[20].mxu0 }
 0x72c   : > { %v2434_v62 = vpop.f32.mrb[21].mxu0  ;;  %v1341_v0 = vsel %vm801_vm3, %v1332_v61, -inf }
 0x72d   : > { %1342 = vmax.xlane.f32.xlu1 %v1341_v0  ;;  %v1335_v1 = vpop.f32.mrb[22].mxu0 }
 0x72e   : > { %v2435_v2 = vpop.f32.mrb[23].mxu0 }
 0x73e   : > { %1362 = vrot.lane.b32.xlu1 %v3312_v13, %s2926_s21 }
 0x742   : > { %1460 = vrot.lane.b32.xlu1 %v3312_v13, %s2927_s16 }
 0x746   : > { %1510 = vrot.lane.b32.xlu1 %v3315_v16, %s2927_s16 }
 0x74a   : > { %1508 = vrot.lane.b32.xlu1 %v3315_v16, %s2928_s12 }
 0x7b6   : > { %v1340_v4 = vpop.xlane.xlu0 %1339 }
 0x7b7   : > { %v1344_v7 = vsub.f32 %v1282_v55, %v1340_v4 }
 0x7b9   : > { %v1346_v8 = vmul.f32 1.442695, %v1344_v7 }
 0x7ba   : > { %v1343_v9 = vpop.xlane.xlu1 %1342 }
 0x7bb   : > { %2648 = vpow2.f32 %v1346_v8  ;;  %v1345_v10 = vsub.f32 %v1332_v61, %v1343_v9 }
 0x7bd   : > { %v1348_v11 = vmul.f32 1.442695, %v1345_v10 }
 0x7be   : > { %v1363_v12 = vpop.permute.xlu1 %1362 }
 0x7bf   : > { %2650 = vpow2.f32 %v1348_v11  ;;  %v1368_v14 = vsel %vm926_vm4, %v1363_v12, 0 }
 0x7c0   : > { %2437 = vmatpush3.bf16.msra.mxu1 %v1368_v14 }
 0x7c1   : > { %2448 = vmatprep.subr.bf16.mxu1 %v2917_v3 }
 0x7c2   : > { %v1461_v25 = vpop.permute.xlu1 %1460 }
 0x7c3   : > { %v1466_v29 = vsel %vm801_vm3, %v1461_v25, 0 }
 0x7c5   : > { %v2649_v15 = vpop.eup %2648 }
 0x7c6   : > { %v1350_v17 = vsel %vm801_vm3, %v2649_v15, 0.0  ;;  %v1511_v31 = vpop.permute.xlu1 %1510 }
 0x7c7   : > { %1351 = vadd.xlane.f32.xlu0 %v1350_v17  ;;  %v1516_v33 = vsel %vm801_vm3, %v1511_v31, 0 }
 0x7c9   : > { %v2651_v18 = vpop.eup %2650 }
 0x7ca   : > { %v1353_v19 = vsel %vm801_vm3, %v2651_v18, 0.0  ;;  %v1509_v35 = vpop.permute.xlu1 %1508 }
 0x7cb   : > { %1354 = vadd.xlane.f32.xlu0 %v1353_v19  ;;  %v2625_v19 = vld [vmem:[%s3263_s24 + $0x8] sm:$0xff]  }
 0x7e1   : > { %1410 = vrot.lane.b32.xlu0 %v3315_v16, %s2926_s21 }
 0x7e5   : > { %1458 = vrot.lane.b32.xlu0 %v3312_v13, %s2928_s12 }
 0x854   : > { %v1352_v20 = vpop.xlane.xlu0 %1351 }
 0x855   : > { %2652 = vrcp.f32 %v1352_v20 }
 0x858   : > { %v1355_v21 = vpop.xlane.xlu0 %1354 }
 0x859   : > { %2654 = vrcp.f32 %v1355_v21 }
 0x85c   : > { %v1411_v22 = vpop.permute.xlu0 %1410 }
 0x85d   : > { %v1416_v23 = vsel %vm926_vm4, %v1411_v22, 0 }
 0x85e   : > { %2443 = vmatpush3.bf16.msra.mxu0 %v1416_v23 }
 0x85f   : > { %v2653_v24 = vpop.eup %2652  ;;  %2454 = vmatprep.subr.bf16.mxu0 %v2917_v3 }
 0x860   : > { %v1358_v26 = vmul.f32 %v2653_v24, %v2649_v15  ;;  %v1459_v34 = vpop.permute.xlu0 %1458 }
 0x862   : > { %v1360_v27 = vpack.c.bf16 %v1358_v26, %v1358_v26 }
 0x863   : > { %v2655_v28 = vpop.eup %2654 }
 0x864   : > { %v1359_v30 = vmul.f32 %v2655_v28, %v2651_v18  ;;  %2439 = vmatmul.mubr.msk.bf16.vlgmr.msra.gmra.mrb[20].mxu1 %vm801_vm3, %v1360_v27  ;;  %v2624_v18 = vld [vmem:[%s3263_s24] sm:$0xff]   ;;  %s3620_s24 = scalar_lea.vmem [#allocation6], %s3235_s10 }
 0x865   : > { %2449 = vmatpush3.bf16.xpose.msra.mxu1 %v1466_v29  ;;  %2450 = vmatprep.mubr.msk.bf16.mxu1 %vm2918_vm1, %v2917_v3 }
 0x866   : > { %v1361_v32 = vpack.c.bf16 %v1359_v30, %v1359_v30  ;;  %2460 = vmatprep.subr.bf16.mxu1 %v2917_v3 }
 0x868   : > { %2445 = vmatmul.mubr.msk.bf16.vlgmr.msra.gmra.mrb[24].mxu0 %vm801_vm3, %v1361_v32 }
 0x869   : > { %2455 = vmatpush3.bf16.xpose.msra.mxu0 %v1516_v33  ;;  %2456 = vmatprep.mubr.msk.bf16.mxu0 %vm2918_vm1, %v2917_v3 }
 0x86a   : > { %2466 = vmatprep.subr.bf16.mxu0 %v2917_v3 }
 0x86c   : > { %2451 = vmatmul.mubr.msk.bf16.vlgmr.msra.gmra.mrb[24].mxu1 %vm801_vm3, %v1459_v34 }
 0x86d   : > { %2462 = vmatprep.mubr.msk.bf16.mxu1 %vm2918_vm1, %v2917_v3 }
 0x870   : > { %2457 = vmatmul.mubr.msk.bf16.vlgmr.msra.gmra.mrb[28].mxu0 %vm801_vm3, %v1509_v35 }
 0x871   : > { %2468 = vmatprep.mubr.msk.bf16.mxu0 %vm2918_vm1, %v2917_v3 }
 0x937   : > { %v1404_v36 = vpop.f32.mrb[20].mxu1 }
 0x938   : > { %v2440_v37 = vpop.f32.mrb[21].mxu1 }
 0x939   : > { %v1407_v38 = vpop.f32.mrb[22].mxu1 }
 0x93a   : > { %v2441_v39 = vpop.f32.mrb[23].mxu1 }
 0x93b   : > { %v1452_v40 = vpop.f32.mrb[24].mxu0 }
 0x93c   : > { %v2612_v41 = vpack.i.bf16 %v1452_v40, %v1404_v36  ;;  %v2446_v42 = vpop.f32.mrb[25].mxu0 }
 0x93d   : > { %v1455_v43 = vpop.f32.mrb[26].mxu0 }
 0x93e   : > { %v2447_v44 = vpop.f32.mrb[27].mxu0 }
 0x93f   : > { %v1502_v45 = vpop.f32.mrb[24].mxu1 }
 0x940   : > { %v2452_v47 = vpop.f32.mrb[25].mxu1  ;;  %v1558_v48 = vsel %vm801_vm3, %v1502_v45, -inf }
 0x941   : > { %1559 = vmax.xlane.f32.xlu0 %v1558_v48  ;;  %v1505_v49 = vpop.f32.mrb[26].mxu1 }
 0x942   : > { %v2453_v52 = vpop.f32.mrb[27].mxu1 }
 0x943   : > { %v1552_v53 = vpop.f32.mrb[28].mxu0 }
 0x944   : > { %v2458_v54 = vpop.f32.mrb[29].mxu0  ;;  %v1561_v55 = vsel %vm801_vm3, %v1552_v53, -inf }
 0x945   : > { %1562 = vmax.xlane.f32.xlu1 %v1561_v55  ;;  %v1555_v56 = vpop.f32.mrb[30].mxu0 }
 0x946   : > { %v2459_v57 = vpop.f32.mrb[31].mxu0 }
 0x956   : > { %1582 = vrot.lane.b32.xlu1 %v3312_v13, %s2929_s20 }
 0x95a   : > { %2608 = vrot.lane.b32.xlu1 %v2607_v51, %s2930_s27 }
 0x95e   : > { %2613 = vrot.lane.b32.xlu1 %v2612_v41, %s2931_s14 }
 0x9ce   : > { %v1560_v58 = vpop.xlane.xlu0 %1559 }
 0x9cf   : > { %v1564_v60 = vsub.f32 %v1502_v45, %v1560_v58  ;;  %v2295_v45 = vld [vmem:[%s3620_s24] ss:$0 sm:$0xff] }
 0x9d1   : > { %v1566_v61 = vmul.f32 1.442695, %v1564_v60 }
 0x9d2   : > { %v1563_v62 = vpop.xlane.xlu1 %1562 }
 0x9d3   : > { %2656 = vpow2.f32 %v1566_v61  ;;  %v1565_v0 = vsub.f32 %v1552_v53, %v1563_v62 }
 0x9d5   : > { %v1568_v1 = vmul.f32 1.442695, %v1565_v0 }
 0x9d6   : > { %v1583_v2 = vpop.permute.xlu1 %1582 }
 0x9d7   : > { %2658 = vpow2.f32 %v1568_v1  ;;  %v1588_v4 = vsel %vm926_vm4, %v1583_v2, 0 }
 0x9d8   : > { %2461 = vmatpush3.bf16.msra.mxu1 %v1588_v4  ;;  %v2626_v4 = vld [vmem:[%s3268_s25] sm:$0xff]  }
 0x9d9   : > { %2472 = vmatprep.subr.bf16.mxu1 %v2917_v3 }
 0x9da   : > { %v2609_v29 = vpop.permute.xlu1 %2608 }
 0x9db   : > { %v2611_v31 = vunpack.i.h.bf16 %v2609_v29  ;;  %v2610_v32 = vunpack.i.l.bf16 %v2609_v29 }
 0x9dd   : > { %v2657_v13 = vpop.eup %2656  ;;  %v1703_v36 = vsel %vm801_vm3, %v3362_v63, %v2611_v31  ;;  %v1702_v37 = vsel %vm801_vm3, %v3360_v59, %v2610_v32 }
 0x9de   : > { %v1570_v46 = vsel %vm801_vm3, %v2657_v13, 0.0  ;;  %v2614_v30 = vpop.permute.xlu1 %2613 }
 0x9df   : > { %1571 = vadd.xlane.f32.xlu0 %v1570_v46  ;;  %v2616_v33 = vunpack.i.h.bf16 %v2614_v30  ;;  %v2615_v34 = vunpack.i.l.bf16 %v2614_v30  ;;  %v2628_v46 = vld [vmem:[%s3274_s17] sm:$0xff]  }
 0x9e1   : > { %v2659_v50 = vpop.eup %2658  ;;  %v1705_v40 = vsel %vm1704_vm5, %v1702_v37, %v2615_v34  ;;  %v1706_v41 = vsel %vm1704_vm5, %v1703_v36, %v2616_v33 }
 0x9e2   : > { %v1573_v51 = vsel %vm801_vm3, %v2659_v50, 0.0 }
 0x9e3   : > { %1574 = vadd.xlane.f32.xlu0 %v1573_v51 }
 0x9f9   : > { %1630 = vrot.lane.b32.xlu0 %v3315_v16, %s2929_s20 }
 0xa6c   : > { %v1572_v7 = vpop.xlane.xlu0 %1571 }
 0xa6d   : > { %2660 = vrcp.f32 %v1572_v7 }
 0xa70   : > { %v1575_v8 = vpop.xlane.xlu0 %1574 }
 0xa71   : > { %2662 = vrcp.f32 %v1575_v8 }
 0xa74   : > { %v1631_v9 = vpop.permute.xlu0 %1630 }
 0xa75   : > { %v1636_v10 = vsel %vm926_vm4, %v1631_v9, 0 }
 0xa76   : > { %2467 = vmatpush3.bf16.msra.mxu0 %v1636_v10 }
 0xa77   : > { %v2661_v11 = vpop.eup %2660  ;;  %2480 = vmatprep.subr.bf16.mxu0 %v2917_v3 }
 0xa78   : > { %v1578_v12 = vmul.f32 %v2661_v11, %v2657_v13  ;;  %v2627_v13 = vld [vmem:[%s3268_s25 + $0x8] sm:$0xff]   ;;  %s3621_s25 = scalar_lea.vmem [#allocation8], %s3235_s10 }
 0xa7a   : > { %v1580_v14 = vpack.c.bf16 %v1578_v12, %v1578_v12 }
 0xa7b   : > { %v2663_v15 = vpop.eup %2662 }
 0xa7c   : > { %v1579_v17 = vmul.f32 %v2663_v15, %v2659_v50  ;;  %2463 = vmatmul.mubr.msk.bf16.vlgmr.msra.gmra.mrb[28].mxu1 %vm801_vm3, %v1580_v14  ;;  %v2629_v50 = vld [vmem:[%s3274_s17 + $0x8] sm:$0xff]   ;;  %v2299_v14 = vld [vmem:[%s3621_s25] ss:$0 sm:$0xff] }
 0xa7d   : > { %2476 = vmatprep.mubr.msk.bf16.mxu1 %vm2918_vm1, %v2917_v3  ;;  %2473 = vmatpush3.bf16.msra.mxu1 %v2624_v18 }
 0xa7e   : > { %v1581_v16 = vpack.c.bf16 %v1579_v17, %v1579_v17  ;;  %2474 = vmatprep.subr.bf16.mxu1 %v2917_v3 }
 0xa80   : > { %2469 = vmatmul.mubr.msk.bf16.vlgmr.msra.gmra.mrb[32].mxu0 %vm801_vm3, %v1581_v16 }
 0xa81   : > { %2484 = vmatprep.mubr.msk.bf16.mxu0 %vm2918_vm1, %v2917_v3  ;;  %2475 = vmatpush3.bf16.msra.mxu1 %v2625_v19  ;;  %v2300_v19 = vld [vmem:[%s3622_s1] ss:$0 sm:$0xff] }
 0xa82   : > { %2488 = vmatprep.subr.bf16.mxu1 %v2917_v3  ;;  %2481 = vmatpush3.bf16.msra.mxu0 %v2626_v4  ;;  %v2312_v4 = vld [vmem:[%s713_s18] ss:$0 sm:$0xff] }
 0xa83   : > { %2482 = vmatprep.subr.bf16.mxu0 %v2917_v3 }
 0xa86   : > { %2483 = vmatpush3.bf16.msra.mxu0 %v2627_v13 }
 0xb4f   : > { %v1624_v20 = vpop.f32.mrb[28].mxu1 }
 0xb50   : > { %v2464_v21 = vpop.f32.mrb[29].mxu1 }
 0xb51   : > { %v1627_v22 = vpop.f32.mrb[30].mxu1 }
 0xb52   : > { %v2465_v23 = vpop.f32.mrb[31].mxu1 }
 0xb53   : > { %v1672_v24 = vpop.f32.mrb[32].mxu0 }
 0xb54   : > { %v2617_v25 = vpack.i.bf16 %v1672_v24, %v1624_v20  ;;  %v2470_v26 = vpop.f32.mrb[33].mxu0  ;;  %v2630_v24 = vld [vmem:[%s3274_s17 + $0x10] sm:$0xff]  }
 0xb55   : > { %v1675_v27 = vpop.f32.mrb[34].mxu0  ;;  %v2301_v26 = vld [vmem:[%s600_s6] ss:$0 sm:$0xff] }
 0xb56   : > { %2618 = vrot.lane.b32.xlu0 %v2617_v25, %s2932_s0  ;;  %v2471_v28 = vpop.f32.mrb[35].mxu0  ;;  %v2631_v25 = vld [vmem:[%s3274_s17 + $0x18] sm:$0xff]  }
 0xbc8   : > { %v2619_v35 = vpop.permute.xlu0 %2618 }
 0xbc9   : > { %v2621_v38 = vunpack.i.h.bf16 %v2619_v35  ;;  %v2620_v39 = vunpack.i.l.bf16 %v2619_v35 }
 0xbcb   : > { %v1709_v42 = vsel %vm1707_vm6, %v1706_v41, %v2621_v38  ;;  %v1708_v43 = vsel %vm1707_vm6, %v1705_v40, %v2620_v39 }
 0xbcc   : > { %v1710_v44 = vpack.c.bf16 %v1709_v42, %v1708_v43 }
 0xbce   : > { %2477 = vmatmul.mubr.msk.bf16.vlgmr.msra.gmra.mrb[32].mxu1 %vm751_vm2, %v1710_v44 }
 0xbcf   : > { %2496 = vmatprep.mubr.msk.bf16.mxu1 %vm2918_vm1, %v2917_v3  ;;  %2489 = vmatpush3.bf16.msra.mxu1 %v2628_v46 }
 0xbd0   : > { %2490 = vmatprep.subr.bf16.mxu1 %v2917_v3 }
 0xbd3   : > { %2491 = vmatpush3.bf16.msra.mxu1 %v2629_v50 }
 0xbd4   : > { %2492 = vmatprep.subr.bf16.mxu1 %v2917_v3 }
 0xbd7   : > { %2493 = vmatpush3.bf16.msra.mxu1 %v2630_v24 }
 0xbd8   : > { %2494 = vmatprep.subr.bf16.mxu1 %v2917_v3  ;;  %v2305_v3 = vld [vmem:[%s707_s11] ss:$0 sm:$0xff] }
 0xbdb   : > { %2495 = vmatpush3.bf16.msra.mxu1 %v2631_v25 }
 0xca1   : > { %v1771_v47 = vpop.f32.mrb[32].mxu1 }
 0xca2   : > { %v1772_v48 = vadd.f32 %v2295_v45, %v1771_v47  ;;  %v2478_v63 = vpop.f32.mrb[33].mxu1 }
 0xca3   : > { %v1774_v49 = vpop.f32.mrb[34].mxu1 }
 0xca4   : > { %v1775_v52 = vadd.f32 %v2295_v45, %v1774_v49  ;;  %v2479_v59 = vpop.f32.mrb[35].mxu1  ;;  %v1778_v53 = vadd.f32 %v1772_v48, %v3294_v5 }
 0xca6   : > { %v1780_v54 = vsel %vm751_vm2, %v1778_v53, 0.0  ;;  %v1779_v55 = vadd.f32 %v1775_v52, %v3296_v6 }
 0xca7   : > { %1781 = vadd.xlane.f32.xlu1 %v1780_v54 }
 0xca8   : > { %v1783_v56 = vsel %vm751_vm2, %v1779_v55, 0.0 }
 0xca9   : > { %1784 = vadd.xlane.f32.xlu0 %v1783_v56 }
 0xd34   : > { %v1782_v57 = vpop.xlane.xlu1 %1781 }
 0xd35   : > { %v1787_v58 = vmul.f32 0.03125, %v1782_v57 }
 0xd36   : > { %v1785_v60 = vpop.xlane.xlu0 %1784 }
 0xd37   : > { %v1789_v61 = vsub.f32 %v1778_v53, %v1787_v58  ;;  %v1788_v62 = vmul.f32 0.03125, %v1785_v60 }
 0xd39   : > { %v1790_v0 = vsub.f32 %v1779_v55, %v1788_v62  ;;  %v1791_v1 = vmul.f32 %v1789_v61, %v1789_v61 }
 0xd3b   : > { %v1793_v5 = vsel %vm751_vm2, %v1791_v1, 0.0  ;;  %v1792_v2 = vmul.f32 %v1790_v0, %v1790_v0 }
 0xd3c   : > { %1794 = vadd.xlane.f32.xlu0 %v1793_v5  ;;  %v2311_v5 = vld [vmem:[%s710_s29] ss:$0 sm:$0xff] }
 0xd3d   : > { %v1796_v6 = vsel %vm751_vm2, %v1792_v2, 0.0 }
 0xd3e   : > { %1797 = vadd.xlane.f32.xlu1 %v1796_v6 }
 0xdc9   : > { %v1795_v51 = vpop.xlane.xlu0 %1794 }
 0xdca   : > { %v1799_v7 = vmul.f32 0.03125, %v1795_v51 }
 0xdcb   : > { %v1798_v8 = vpop.xlane.xlu1 %1797 }
 0xdcc   : > { %v1801_v9 = vadd.f32 1e-05, %v1799_v7  ;;  %v1800_v10 = vmul.f32 0.03125, %v1798_v8 }
 0xdce   : > { %2664 = vrsqrt.f32 %v1801_v9  ;;  %v1802_v11 = vadd.f32 1e-05, %v1800_v10 }
 0xdd0   : > { %2666 = vrsqrt.f32 %v1802_v11 }
 0xdd8   : > { %v2665_v12 = vpop.eup %2664 }
 0xdd9   : > { %v1805_v15 = vmul.f32 %v2665_v12, %v1789_v61 }
 0xdda   : > { %v2667_v17 = vpop.eup %2666 }
 0xddb   : > { %v1814_v16 = vmul.f32 %v2299_v14, %v1805_v15  ;;  %v1806_v18 = vmul.f32 %v2667_v17, %v1790_v0 }
 0xddd   : > { %v1815_v20 = vmul.f32 %v2299_v14, %v1806_v18  ;;  %v1823_v21 = vadd.f32 %v2300_v19, %v1814_v16 }
 0xddf   : > { %v1824_v22 = vadd.f32 %v2300_v19, %v1815_v20 }
 0xde1   : > { %v1825_v23 = vpack.c.bf16 %v1824_v22, %v1823_v21 }
 0xde3   : > { %2485 = vmatmul.mubr.msk.bf16.vlgmr.msra.gmra.mrb[36].mxu0 %vm751_vm2, %v1825_v23 }
 0xeb6   : > { %v1886_v27 = vpop.f32.mrb[36].mxu0 }
 0xeb7   : > { %v1887_v28 = vadd.f32 %v2301_v26, %v1886_v27  ;;  %v2486_v29 = vpop.f32.mrb[37].mxu0 }
 0xeb8   : > { %v1889_v30 = vpop.f32.mrb[38].mxu0 }
 0xeb9   : > { %v1890_v31 = vadd.f32 %v2301_v26, %v1889_v30  ;;  %v2487_v32 = vpop.f32.mrb[39].mxu0  ;;  %v1893_v33 = vmax.f32 %v1887_v28, 0.0 }
 0xebb   : > { %v1894_v34 = vmax.f32 %v1890_v31, 0.0 }
 0xebd   : > { %v1895_v35 = vpack.c.bf16 %v1894_v34, %v1893_v33 }
 0xebf   : > { %2497 = vmatmul.mubr.msk.bf16.vlgmr.msra.gmra.mrb[36].mxu1 %vm1935_vm7, %v1895_v35 }
 0xf92   : > { %v1973_v36 = vpop.f32.mrb[36].mxu1 }
 0xf93   : > { %v1974_v37 = vadd.f32 %v2305_v3, %v1973_v36  ;;  %v2498_v38 = vpop.f32.mrb[37].mxu1 }
 0xf94   : > { %v1976_v39 = vpop.f32.mrb[38].mxu1 }
 0xf95   : > { %v1977_v40 = vadd.f32 %v2305_v3, %v1976_v39  ;;  %v2499_v41 = vpop.f32.mrb[39].mxu1  ;;  %v1980_v42 = vadd.f32 %v1974_v37, %v1823_v21 }
 0xf97   : > { %v1982_v43 = vsel %vm751_vm2, %v1980_v42, 0.0  ;;  %v1981_v44 = vadd.f32 %v1977_v40, %v1824_v22 }
 0xf98   : > { %1983 = vadd.xlane.f32.xlu0 %v1982_v43 }
 0xf99   : > { %v1985_v45 = vsel %vm751_vm2, %v1981_v44, 0.0 }
 0xf9a   : > { %1986 = vadd.xlane.f32.xlu1 %v1985_v45 }
0x1025   : > { %v1984_v47 = vpop.xlane.xlu0 %1983 }
0x1026   : > { %v1988_v48 = vmul.f32 0.03125, %v1984_v47 }
0x1027   : > { %v1987_v63 = vpop.xlane.xlu1 %1986 }
0x1028   : > { %v1990_v49 = vsub.f32 %v1980_v42, %v1988_v48  ;;  %v1989_v52 = vmul.f32 0.03125, %v1987_v63 }
0x102a   : > { %v1991_v59 = vsub.f32 %v1981_v44, %v1989_v52  ;;  %v1992_v53 = vmul.f32 %v1990_v49, %v1990_v49 }
0x102c   : > { %v1994_v54 = vsel %vm751_vm2, %v1992_v53, 0.0  ;;  %v1993_v55 = vmul.f32 %v1991_v59, %v1991_v59 }
0x102d   : > { %1995 = vadd.xlane.f32.xlu0 %v1994_v54 }
0x102e   : > { %v1997_v56 = vsel %vm751_vm2, %v1993_v55, 0.0 }
0x102f   : > { %1998 = vadd.xlane.f32.xlu1 %v1997_v56 }
0x10ba   : > { %v1996_v57 = vpop.xlane.xlu0 %1995 }
0x10bb   : > { %v2000_v58 = vmul.f32 0.03125, %v1996_v57 }
0x10bc   : > { %v1999_v60 = vpop.xlane.xlu1 %1998 }
0x10bd   : > { %v2002_v61 = vadd.f32 1e-05, %v2000_v58  ;;  %v2001_v62 = vmul.f32 0.03125, %v1999_v60 }
0x10bf   : > { %2668 = vrsqrt.f32 %v2002_v61  ;;  %v2003_v0 = vadd.f32 1e-05, %v2001_v62 }
0x10c1   : > { %2670 = vrsqrt.f32 %v2003_v0 }
0x10c9   : > { %v2669_v1 = vpop.eup %2668 }
0x10ca   : > { %v2006_v2 = vmul.f32 %v2669_v1, %v1990_v49 }
0x10cb   : > { %v2671_v6 = vpop.eup %2670 }
0x10cc   : > { %v2015_v13 = vmul.f32 %v2311_v5, %v2006_v2  ;;  %v2007_v46 = vmul.f32 %v2671_v6, %v1991_v59  ;;  %2031 = sbr.rel (%p2313_p9) target bundleno = 4307 (0x10d3), region = 100 }
0x10ce   : > { %v2024_v50 = vadd.f32 %v2312_v4, %v2015_v13  ;;  %v2016_v51 = vmul.f32 %v2311_v5, %v2007_v46 }
0x10d0   : > { %2026 = vst.msk [vmem:[#allocation2] sm:$0xff] %vm751_vm2, %v2024_v50  ;;  %v2025_v7 = vadd.f32 %v2312_v4, %v2016_v51  ;;  %2032 = vst.msk [vmem:[#allocation12] sm:$0xff] (!%p2313_p9), %vm751_vm2, %v2024_v50 }
0x10d2   : > { %2027 = vst.msk [vmem:[#allocation2 + $0x8] sm:$0xff] %vm751_vm2, %v2025_v7  ;;  %2033 = vst.msk [vmem:[#allocation12 + $0x8] sm:$0xff] (!%p2313_p9), %vm751_vm2, %v2025_v7 }
0x10d3 PF: > { %p2536_p12 = scmp.eq.s32.totalorder %s3130_s4, 1  ;;  %s2933_s30 = smov [#allocation12]  }
0x10d4   : > { %s2043_s29 = sshll.u32 %s2933_s30, 4  ;;  %s2044_s29 = int_to_ptr.vmem [resolvable:$true] %s2043_s29 }
0x10d5   : > { %s2820_s18 = scalar_lea.vmem %s2044_s29, 256  ;;  %p2827_p6 = scmp.lt.s32.totalorder %s2044_s29, %s2044_s29 }
0x10d6   : > { %p2821_p13 = scmp.ne.s32.totalorder %s2044_s29, %s2820_s18  ;;  %p2828_p0 = scmp.lt.s32.totalorder %s2820_s18, %s2820_s18 }
0x10d8   : > { %p2822_p8 = pnand %p2821_p13, %p2536_p12  ;;  %p2829_p1 = por %p2828_p0, %p2827_p6 }
0x10da   : > { %p2823_p2 = pneg %p2822_p8 }
0x10dc   : > { %p2830_p7 = pnand %p2829_p1, %p2823_p2 }
0x10de   : > { %2833 = shalt.err (!%p2830_p7)
}
0x10df   : > { %s3626_s19 = sld [smem:[#allocation32_spill]] }
0x10e5   : > { %s2834_s22 = scalar_lea.hbm %s3626_s19, 256 }
0x10e6   : > { %p2835_p10 = scmp.ne.s32.totalorder %s3626_s19, %s2834_s22  ;;  %p2840_p3 = scmp.lt.u32.totalorder %s2834_s22, %s3626_s19 }
0x10e8   : > { %p2836_p11 = pnand %p2835_p10, %p2536_p12 }
0x10ea   : > { %p2837_p5 = pneg %p2836_p11 }
0x10ec   : > { %p2842_p4 = pnand %p2840_p3, %p2837_p5 }
0x10ee   : > { %2845 = shalt.err (!%p2842_p4)
}
0x10ef   : > { %s2934_s14 = smov 128  }
0x10f0   : > { %2513 = dma.vmem_to_hbm [thread:$0]  (%p2536_p12), %s2044_s29, 256, %s3626_s19, [#allocation5], %s2934_s14, %s2934_s14, %s2930_s27  }
0x10f1   : > { %2883 = dma.done.wait (%p2536_p12), [#allocation5], 256  }
0x10f2   : > { %2885 = vsyncadd (%p2536_p12), [#allocation5], 4294967040 }
0x10f3 PF: > { %s3627_s25 = sld [smem:[#allocation19_spill]]  ;;  %s3628_s1 = sld [smem:[#allocation17_spill]] }
0x10f4   : > { %s3629_s27 = sld [smem:[#allocation21_spill]]  ;;  %s3630_s28 = sld [smem:[#allocation18_spill]] }
0x10f5   : > { %s3631_s29 = sld [smem:[#allocation20_spill]] }
0x10f9   : > { %s31_s30 = sadd.s32 1, %s3627_s25   ;;  %s3632_s25 = smov %s2892_s26 }
0x10fa   : > { %p28_p9 = scmp.ge.s32.totalorder %s31_s30, 4   ;;  %s3633_s26 = smov %s3628_s1 }
0x10fc   :  { %30 = sbr.rel (!%p28_p9) target bundleno = 20 (0x14), region = 183 }
0x1103   :  { %2059 = vsyncpa [#allocation4], 1 }
0x1104   :  { %2061 = vsyncpa [#allocation4 + $0x1], 1 }
0x1105   :  { %2062 = vsyncpa [#allocation7], 1 }
0x1106   :  { %2064 = vsyncpa [#allocation7 + $0x1], 1 }
0x1107   :  { %2065 = vsyncpa [#allocation10], 1 }
0x1108   :  { %2067 = vsyncpa [#allocation10 + $0x1], 1 }
0x1109   :  { %2068 = vsyncpa [#allocation5], 1 }
0x110a   :  { %2070 = vsyncpa [#allocation5 + $0x1], 1 }

</bundles_post_ra>
